<compile_context>
chip_gen: v5e
topology: v5e:2x2
jax: 0.10.0
libtpu: 0.0.40
codegen_flags: <defaults>
</compile_context>

<pallas_src>
import math

import jax
import jax.numpy as jnp
from jax.experimental import pallas as pl
from jax.experimental.pallas import tpu as pltpu

# ----------------------------- config (small) -----------------------------
BATCH      = 2
SEQ        = 8
HIDDEN     = 32
NUM_HEADS  = 4
HEAD_DIM   = HIDDEN // NUM_HEADS          # 8
MLP_DIM    = 64
NUM_LAYERS = 2
LN_EPS     = 1e-6
SCALE      = HEAD_DIM ** (-0.5)
DTYPE      = jnp.float32
TOKENS     = BATCH * SEQ                  # 16

# ------------------------- parameter slab layout ---------------------------
# One lane-dense f32 slab of shape (TOTAL_ROWS, 128):
#   per layer l, rows [l*128, (l+1)*128):
#     rows  0..31 , cols  0..95 : Wqkv  = [Wq*scale | Wk | Wv]        (32, 96)
#     rows 32..63 , cols  0..31 : Wo                                   (32, 32)
#     rows 32..63 , cols 32..95 : W1                                   (32, 64)
#     rows 64..127, cols  0..31 : W2                                   (64, 32)
#   vector rows start at VEC_BASE = NUM_LAYERS*128; per layer 3 rows:
#     row 3l+0: [ln1_w | ln1_b | ln2_w | ln2_b]                        (128,)
#     row 3l+1: [bq*scale | bk | bv | 0...]                            (96,+pad)
#     row 3l+2: [bo | b1 | b2]                                         (128,)
#   final row 3*NUM_LAYERS: [enc_norm_w | enc_norm_b | 0...]
LANES      = 128
MAT_ROWS   = 128
VEC_BASE   = NUM_LAYERS * MAT_ROWS
N_VEC_ROWS = 3 * NUM_LAYERS + 1
TOTAL_ROWS = VEC_BASE + ((N_VEC_ROWS + 7) // 8) * 8

# bf16 matmul operands (f32 accumulate) — production choice for real sizes;
# kept off here so the numeric check against the f32 reference stays tight.
USE_BF16_MATMUL = False


# ------------------------------ kernel helpers -----------------------------
def _mm(a, b):
    """Projection / MLP matmul: optionally bf16 operands, f32 accumulation."""
    if USE_BF16_MATMUL:
        a = a.astype(jnp.bfloat16)
        b = b.astype(jnp.bfloat16)
    return jnp.dot(a, b, preferred_element_type=jnp.float32)


def _layernorm(x, w, b):
    # x: (T, C); w, b: (1, C). Biased variance (matches nn.LayerNorm).
    mean = jnp.mean(x, axis=-1, keepdims=True)
    xc = x - mean
    var = jnp.mean(xc * xc, axis=-1, keepdims=True)
    inv = jax.lax.rsqrt(var + LN_EPS)
    return xc * inv * w + b


def _softmax_lastdim(x):
    m = jnp.max(x, axis=-1, keepdims=True)
    e = jnp.exp(x - m)
    s = jnp.sum(e, axis=-1, keepdims=True)
    return e / s           # exact divide (per perf review; VPU has slack here)


def _gelu_exact(x):
    # F.gelu default (erf-based), not the tanh approximation.
    return 0.5 * x * (1.0 + jax.lax.erf(x * (1.0 / math.sqrt(2.0))))


# ------------------------------ Pallas kernel ------------------------------
def encoder_kernel(x_ref, w_ref, o_ref, qkv_scr, ctx_scr):
    x = x_ref[...].astype(jnp.float32)                       # (T, H), T = B*S

    for l in range(NUM_LAYERS):                              # static unroll over layers
        mb = l * MAT_ROWS
        vr = VEC_BASE + 3 * l

        # -------- static views into the packed parameter slab --------
        wqkv = w_ref[mb:mb + HIDDEN, 0:3 * HIDDEN]                       # (32, 96)
        wo   = w_ref[mb + HIDDEN:mb + 2 * HIDDEN, 0:HIDDEN]              # (32, 32)
        w1   = w_ref[mb + HIDDEN:mb + 2 * HIDDEN, HIDDEN:HIDDEN + MLP_DIM]      # (32, 64)
        w2   = w_ref[mb + 2 * HIDDEN:mb + 2 * HIDDEN + MLP_DIM, 0:HIDDEN]       # (64, 32)

        ln1w = w_ref[vr:vr + 1, 0:HIDDEN]                                # (1, 32)
        ln1b = w_ref[vr:vr + 1, HIDDEN:2 * HIDDEN]
        ln2w = w_ref[vr:vr + 1, 2 * HIDDEN:3 * HIDDEN]
        ln2b = w_ref[vr:vr + 1, 3 * HIDDEN:4 * HIDDEN]
        bqkv = w_ref[vr + 1:vr + 2, 0:3 * HIDDEN]                        # (1, 96)
        bo   = w_ref[vr + 2:vr + 3, 0:HIDDEN]                            # (1, 32)
        b1   = w_ref[vr + 2:vr + 3, HIDDEN:HIDDEN + MLP_DIM]             # (1, 64)
        b2   = w_ref[vr + 2:vr + 3, HIDDEN + MLP_DIM:2 * HIDDEN + MLP_DIM]  # (1, 32)

        # ---------------- attention branch ----------------
        h = _layernorm(x, ln1w, ln1b)                        # (T, H)

        # one fused QKV projection; attention scale already folded into Wq/bq
        qkv_scr[...] = _mm(h, wqkv) + bqkv                   # (T, 3H) VMEM scratch

        for n in range(NUM_HEADS):                           # static unroll; head split
            lo = n * HEAD_DIM                                # via scratch lane slices
            q = qkv_scr[:, lo:lo + HEAD_DIM].reshape(BATCH, SEQ, HEAD_DIM)
            k = qkv_scr[:, HIDDEN + lo:HIDDEN + lo + HEAD_DIM].reshape(BATCH, SEQ, HEAD_DIM)
            v = qkv_scr[:, 2 * HIDDEN + lo:2 * HIDDEN + lo + HEAD_DIM].reshape(BATCH, SEQ, HEAD_DIM)

            logits = jnp.einsum('bqd,bkd->bqk', q, k,
                                preferred_element_type=jnp.float32)     # (B, S, S)
            attn = _softmax_lastdim(logits)
            ctx_h = jnp.einsum('bqk,bkd->bqd', attn, v,
                               preferred_element_type=jnp.float32)      # (B, S, Dh)

            # head "concat" = lane-slice store into the context scratch
            ctx_scr[:, lo:lo + HEAD_DIM] = ctx_h.reshape(TOKENS, HEAD_DIM)

        # single K=32 output projection against the un-split Wo
        x = _mm(ctx_scr[...], wo) + bo + x                   # residual 1

        # ---------------- MLP branch ----------------
        h2 = _layernorm(x, ln2w, ln2b)
        m = _gelu_exact(_mm(h2, w1) + b1)
        x = _mm(m, w2) + b2 + x                              # residual 2

    # final encoder LayerNorm
    fr = VEC_BASE + 3 * NUM_LAYERS
    fw = w_ref[fr:fr + 1, 0:HIDDEN]
    fb = w_ref[fr:fr + 1, HIDDEN:2 * HIDDEN]
    o_ref[...] = _layernorm(x, fw, fb).astype(o_ref.dtype)


# ------------------------------- wrappers -----------------------------------
def pack_params(layer_params, final_w, final_b):
    """Pack every parameter into one lane-dense (TOTAL_ROWS, 128) f32 slab.
    The attention scale is folded into Wq/bq here (outside the hot path)."""
    slab = jnp.zeros((TOTAL_ROWS, LANES), jnp.float32)
    for l, p in enumerate(layer_params):
        mb = l * MAT_ROWS
        wqkv = jnp.concatenate([p["wq"] * SCALE, p["wk"], p["wv"]], axis=1)  # (32, 96)
        slab = slab.at[mb:mb + HIDDEN, 0:3 * HIDDEN].set(wqkv)
        slab = slab.at[mb + HIDDEN:mb + 2 * HIDDEN, 0:HIDDEN].set(p["wo"])
        slab = slab.at[mb + HIDDEN:mb + 2 * HIDDEN, HIDDEN:HIDDEN + MLP_DIM].set(p["w1"])
        slab = slab.at[mb + 2 * HIDDEN:mb + 2 * HIDDEN + MLP_DIM, 0:HIDDEN].set(p["w2"])

        vr = VEC_BASE + 3 * l
        ln_row = jnp.concatenate([p["ln1_w"], p["ln1_b"], p["ln2_w"], p["ln2_b"]])   # (128,)
        slab = slab.at[vr, :].set(ln_row)
        bqkv = jnp.concatenate([p["bq"] * SCALE, p["bk"], p["bv"]])                  # (96,)
        slab = slab.at[vr + 1, 0:3 * HIDDEN].set(bqkv)
        b_row = jnp.concatenate([p["bo"], p["b1"], p["b2"]])                         # (128,)
        slab = slab.at[vr + 2, :].set(b_row)

    fr = VEC_BASE + 3 * NUM_LAYERS
    slab = slab.at[fr, 0:HIDDEN].set(final_w)
    slab = slab.at[fr, HIDDEN:2 * HIDDEN].set(final_b)
    return slab


def transformer_encoder(x, layer_params, final_w, final_b, vis=False):
    # TODO(synk): vis=True (surfacing per-layer attention maps) is not returned
    # from the fused kernel; eval-mode dropout is identity and is omitted.
    B, S, H = x.shape
    slab = pack_params(layer_params, final_w, final_b)

    out_flat = pl.pallas_call(
        encoder_kernel,
        out_shape=jax.ShapeDtypeStruct((B * S, H), x.dtype),
        in_specs=[pl.BlockSpec(memory_space=pltpu.MemorySpace.VMEM),   # activations
                  pl.BlockSpec(memory_space=pltpu.MemorySpace.VMEM)],  # packed params
        out_specs=pl.BlockSpec(memory_space=pltpu.MemorySpace.VMEM),
        scratch_shapes=[pltpu.VMEM((TOKENS, 3 * HIDDEN), jnp.float32),  # fused QKV
                        pltpu.VMEM((TOKENS, HIDDEN), jnp.float32)],     # head concat
    )(x.reshape(B * S, H), slab)

    attn_weights = []   # vis=False -> stays empty (matches the PyTorch module)
    return out_flat.reshape(B, S, H), attn_weights


# --------------------------- pure-JAX reference ------------------------------
def _ref_block(x, p):
    def ln(y, w, b):
        mu = jnp.mean(y, -1, keepdims=True)
        var = jnp.mean((y - mu) ** 2, -1, keepdims=True)
        return (y - mu) / jnp.sqrt(var + LN_EPS) * w + b

    h = ln(x, p["ln1_w"], p["ln1_b"])
    q = h @ p["wq"] + p["bq"]
    k = h @ p["wk"] + p["bk"]
    v = h @ p["wv"] + p["bv"]
    B, S, H = x.shape
    q = q.reshape(B, S, NUM_HEADS, HEAD_DIM).transpose(0, 2, 1, 3)
    k = k.reshape(B, S, NUM_HEADS, HEAD_DIM).transpose(0, 2, 1, 3)
    v = v.reshape(B, S, NUM_HEADS, HEAD_DIM).transpose(0, 2, 1, 3)
    logits = jnp.einsum("bhqd,bhkd->bhqk", q, k) * SCALE
    attn = jax.nn.softmax(logits, axis=-1)
    ctx = jnp.einsum("bhqk,bhkd->bhqd", attn, v).transpose(0, 2, 1, 3).reshape(B, S, H)
    h1 = ctx @ p["wo"] + p["bo"] + x
    h2 = ln(h1, p["ln2_w"], p["ln2_b"])
    m = jax.nn.gelu(h2 @ p["w1"] + p["b1"], approximate=False)
    return m @ p["w2"] + p["b2"] + h1


def _ref_encoder(x, layer_params, fw, fb):
    for p in layer_params:
        x = _ref_block(x, p)
    mu = jnp.mean(x, -1, keepdims=True)
    var = jnp.mean((x - mu) ** 2, -1, keepdims=True)
    return (x - mu) / jnp.sqrt(var + LN_EPS) * fw + fb


# ------------------------------ param init -----------------------------------
def init_params(key):
    layer_params = []
    for _ in range(NUM_LAYERS):
        keys = jax.random.split(key, 8)
        key = keys[-1]
        p = {
            "ln1_w": jnp.ones((HIDDEN,), DTYPE),
            "ln1_b": jnp.zeros((HIDDEN,), DTYPE),
            "wq": 0.05 * jax.random.normal(keys[0], (HIDDEN, HIDDEN), DTYPE),
            "bq": jnp.zeros((HIDDEN,), DTYPE),
            "wk": 0.05 * jax.random.normal(keys[1], (HIDDEN, HIDDEN), DTYPE),
            "bk": jnp.zeros((HIDDEN,), DTYPE),
            "wv": 0.05 * jax.random.normal(keys[2], (HIDDEN, HIDDEN), DTYPE),
            "bv": jnp.zeros((HIDDEN,), DTYPE),
            "wo": 0.05 * jax.random.normal(keys[3], (HIDDEN, HIDDEN), DTYPE),
            "bo": 1e-3 * jax.random.normal(keys[4], (HIDDEN,), DTYPE),
            "ln2_w": jnp.ones((HIDDEN,), DTYPE),
            "ln2_b": jnp.zeros((HIDDEN,), DTYPE),
            "w1": 0.05 * jax.random.normal(keys[5], (HIDDEN, MLP_DIM), DTYPE),
            "b1": 1e-6 * jnp.ones((MLP_DIM,), DTYPE),
            "w2": 0.05 * jax.random.normal(keys[6], (MLP_DIM, HIDDEN), DTYPE),
            "b2": 1e-6 * jnp.ones((HIDDEN,), DTYPE),
        }
        layer_params.append(p)
    final_w = jnp.ones((HIDDEN,), DTYPE)
    final_b = jnp.zeros((HIDDEN,), DTYPE)
    return layer_params, final_w, final_b


# --------------------------------- main ---------------------------------------
if __name__ == "__main__":
    key = jax.random.PRNGKey(0)
    k_x, k_p = jax.random.split(key)
    x = jax.random.normal(k_x, (BATCH, SEQ, HIDDEN), DTYPE)
    layer_params, final_w, final_b = init_params(k_p)

    out, attn_weights = transformer_encoder(x, layer_params, final_w, final_b, vis=False)
    out = jax.block_until_ready(out)

    ref = _ref_encoder(x, layer_params, final_w, final_b)
    assert out.shape == (BATCH, SEQ, HIDDEN)
    # exact-divide softmax + f32 matmuls -> tolerance back to tight levels
    err = float(jnp.max(jnp.abs(out - ref)))
    assert err < 1e-4, f"Pallas output mismatch vs reference (max abs err={err})"

    print("KERNEL_OK")
</pallas_src>

<mosaic_0001>
module attributes {stable_mosaic.version = 11 : i64} {
  func.func @encoder_kernel(%arg0: memref<16x32xf32, #tpu.memory_space<vmem>>, %arg1: memref<264x128xf32, #tpu.memory_space<vmem>>, %arg2: memref<16x32xf32, #tpu.memory_space<vmem>>, %arg3: memref<16x96xf32, #tpu.memory_space<vmem>>, %arg4: memref<16x32xf32, #tpu.memory_space<vmem>>) attributes {dimension_semantics = [], scalar_prefetch = 0 : i64, scratch_operands = 2 : i64, tpu.core_type = #tpu.core_type<tc>} {
    %c0 = arith.constant 0 : index
    %c0_0 = arith.constant 0 : index
    %0 = vector.load %arg0[%c0, %c0_0] : memref<16x32xf32, #tpu.memory_space<vmem>>, vector<16x32xf32>
    %c0_1 = arith.constant 0 : index
    %c0_2 = arith.constant 0 : index
    %1 = vector.load %arg1[%c0_1, %c0_2] : memref<264x128xf32, #tpu.memory_space<vmem>>, vector<32x96xf32>
    %c32 = arith.constant 32 : index
    %c0_3 = arith.constant 0 : index
    %2 = vector.load %arg1[%c32, %c0_3] : memref<264x128xf32, #tpu.memory_space<vmem>>, vector<32x32xf32>
    %c32_4 = arith.constant 32 : index
    %c32_5 = arith.constant 32 : index
    %3 = vector.load %arg1[%c32_4, %c32_5] : memref<264x128xf32, #tpu.memory_space<vmem>>, vector<32x64xf32>
    %c64 = arith.constant 64 : index
    %c0_6 = arith.constant 0 : index
    %4 = vector.load %arg1[%c64, %c0_6] : memref<264x128xf32, #tpu.memory_space<vmem>>, vector<64x32xf32>
    %c256 = arith.constant 256 : index
    %c0_7 = arith.constant 0 : index
    %5 = vector.load %arg1[%c256, %c0_7] : memref<264x128xf32, #tpu.memory_space<vmem>>, vector<1x32xf32>
    %c256_8 = arith.constant 256 : index
    %c32_9 = arith.constant 32 : index
    %6 = vector.load %arg1[%c256_8, %c32_9] : memref<264x128xf32, #tpu.memory_space<vmem>>, vector<1x32xf32>
    %c256_10 = arith.constant 256 : index
    %c64_11 = arith.constant 64 : index
    %7 = vector.load %arg1[%c256_10, %c64_11] : memref<264x128xf32, #tpu.memory_space<vmem>>, vector<1x32xf32>
    %c256_12 = arith.constant 256 : index
    %c96 = arith.constant 96 : index
    %8 = vector.load %arg1[%c256_12, %c96] : memref<264x128xf32, #tpu.memory_space<vmem>>, vector<1x32xf32>
    %c257 = arith.constant 257 : index
    %c0_13 = arith.constant 0 : index
    %9 = vector.load %arg1[%c257, %c0_13] : memref<264x128xf32, #tpu.memory_space<vmem>>, vector<1x96xf32>
    %c258 = arith.constant 258 : index
    %c0_14 = arith.constant 0 : index
    %10 = vector.load %arg1[%c258, %c0_14] : memref<264x128xf32, #tpu.memory_space<vmem>>, vector<1x32xf32>
    %c258_15 = arith.constant 258 : index
    %c32_16 = arith.constant 32 : index
    %11 = vector.load %arg1[%c258_15, %c32_16] : memref<264x128xf32, #tpu.memory_space<vmem>>, vector<1x64xf32>
    %c258_17 = arith.constant 258 : index
    %c96_18 = arith.constant 96 : index
    %12 = vector.load %arg1[%c258_17, %c96_18] : memref<264x128xf32, #tpu.memory_space<vmem>>, vector<1x32xf32>
    %cst = arith.constant dense<0.000000e+00> : vector<16xf32>
    %13 = vector.multi_reduction <add>, %0, %cst [1] : vector<16x32xf32> to vector<16xf32>
    %14 = vector.shape_cast %13 : vector<16xf32> to vector<16x1xf32>
    %cst_19 = arith.constant 3.200000e+01 : f32
    %15 = vector.broadcast %cst_19 : f32 to vector<16x1xf32>
    %16 = arith.divf %14, %15 : vector<16x1xf32>
    %17 = vector.broadcast %16 : vector<16x1xf32> to vector<16x32xf32>
    %18 = arith.subf %0, %17 : vector<16x32xf32>
    %19 = arith.mulf %18, %18 : vector<16x32xf32>
    %cst_20 = arith.constant dense<0.000000e+00> : vector<16xf32>
    %20 = vector.multi_reduction <add>, %19, %cst_20 [1] : vector<16x32xf32> to vector<16xf32>
    %21 = vector.shape_cast %20 : vector<16xf32> to vector<16x1xf32>
    %cst_21 = arith.constant 3.200000e+01 : f32
    %22 = vector.broadcast %cst_21 : f32 to vector<16x1xf32>
    %23 = arith.divf %21, %22 : vector<16x1xf32>
    %cst_22 = arith.constant 9.99999997E-7 : f32
    %24 = vector.broadcast %cst_22 : f32 to vector<16x1xf32>
    %25 = arith.addf %23, %24 : vector<16x1xf32>
    %26 = math.rsqrt %25 : vector<16x1xf32>
    %27 = vector.broadcast %26 : vector<16x1xf32> to vector<16x32xf32>
    %28 = arith.mulf %18, %27 : vector<16x32xf32>
    %29 = vector.broadcast %5 : vector<1x32xf32> to vector<16x32xf32>
    %30 = arith.mulf %28, %29 : vector<16x32xf32>
    %31 = vector.broadcast %6 : vector<1x32xf32> to vector<16x32xf32>
    %32 = arith.addf %30, %31 : vector<16x32xf32>
    %cst_23 = arith.constant dense<0.000000e+00> : vector<16x96xf32>
    %33 = tpu.matmul %32, %1, %cst_23 {dimension_numbers = #tpu.dot_dimension_numbers<[1], [0], [0], [1], [0, 0, 1, 1], [], []>} : vector<16x32xf32>, vector<32x96xf32>, vector<16x96xf32> -> vector<16x96xf32>
    %34 = vector.broadcast %9 : vector<1x96xf32> to vector<16x96xf32>
    %35 = arith.addf %33, %34 : vector<16x96xf32>
    %c0_24 = arith.constant 0 : index
    %c0_25 = arith.constant 0 : index
    %36 = vector.load %arg3[%c0_24, %c0_25] : memref<16x96xf32, #tpu.memory_space<vmem>>, vector<16x96xf32>
    tpu.vector_store %arg3[%c0_24, %c0_25], %35 {strides = array<i32>} : memref<16x96xf32, #tpu.memory_space<vmem>>, vector<16x96xf32>,
    %c0_26 = arith.constant 0 : index
    %c0_27 = arith.constant 0 : index
    %37 = vector.load %arg3[%c0_26, %c0_27] : memref<16x96xf32, #tpu.memory_space<vmem>>, vector<16x8xf32>
    %38 = vector.shape_cast %37 : vector<16x8xf32> to vector<2x8x8xf32>
    %c0_28 = arith.constant 0 : index
    %c32_29 = arith.constant 32 : index
    %39 = vector.load %arg3[%c0_28, %c32_29] : memref<16x96xf32, #tpu.memory_space<vmem>>, vector<16x8xf32>
    %40 = vector.shape_cast %39 : vector<16x8xf32> to vector<2x8x8xf32>
    %c0_30 = arith.constant 0 : index
    %c64_31 = arith.constant 64 : index
    %41 = vector.load %arg3[%c0_30, %c64_31] : memref<16x96xf32, #tpu.memory_space<vmem>>, vector<16x8xf32>
    %42 = vector.shape_cast %41 : vector<16x8xf32> to vector<2x8x8xf32>
    "tpu.trace_start"() <{level = 10 : i32, message = "bqd,bkd->bqk"}> : () -> ()
    %cst_32 = arith.constant dense<0.000000e+00> : vector<2x8x8xf32>
    %43 = tpu.matmul %38, %40, %cst_32 {dimension_numbers = #tpu.dot_dimension_numbers<[2], [2], [1], [1], [0, 0, 0, 1, 1, 1], [0], [0]>} : vector<2x8x8xf32>, vector<2x8x8xf32>, vector<2x8x8xf32> -> vector<2x8x8xf32>
    "tpu.trace_stop"() : () -> ()
    %cst_33 = arith.constant dense<0xFF800000> : vector<2x8xf32>
    %44 = vector.multi_reduction <maximumf>, %43, %cst_33 [2] : vector<2x8x8xf32> to vector<2x8xf32>
    %45 = vector.shape_cast %44 : vector<2x8xf32> to vector<2x8x1xf32>
    %46 = vector.broadcast %45 : vector<2x8x1xf32> to vector<2x8x8xf32>
    %47 = arith.subf %43, %46 : vector<2x8x8xf32>
    %48 = math.exp %47 : vector<2x8x8xf32>
    %cst_34 = arith.constant dense<0.000000e+00> : vector<2x8xf32>
    %49 = vector.multi_reduction <add>, %48, %cst_34 [2] : vector<2x8x8xf32> to vector<2x8xf32>
    %50 = vector.shape_cast %49 : vector<2x8xf32> to vector<2x8x1xf32>
    %51 = vector.broadcast %50 : vector<2x8x1xf32> to vector<2x8x8xf32>
    %52 = arith.divf %48, %51 : vector<2x8x8xf32>
    "tpu.trace_start"() <{level = 10 : i32, message = "bqk,bkd->bqd"}> : () -> ()
    %cst_35 = arith.constant dense<0.000000e+00> : vector<2x8x8xf32>
    %53 = tpu.matmul %52, %42, %cst_35 {dimension_numbers = #tpu.dot_dimension_numbers<[2], [1], [1], [2], [0, 0, 0, 1, 1, 2], [0], [0]>} : vector<2x8x8xf32>, vector<2x8x8xf32>, vector<2x8x8xf32> -> vector<2x8x8xf32>
    "tpu.trace_stop"() : () -> ()
    %54 = vector.shape_cast %53 : vector<2x8x8xf32> to vector<16x8xf32>
    %c0_36 = arith.constant 0 : index
    %c0_37 = arith.constant 0 : index
    %55 = vector.load %arg4[%c0_36, %c0_37] : memref<16x32xf32, #tpu.memory_space<vmem>>, vector<16x8xf32>
    tpu.vector_store %arg4[%c0_36, %c0_37], %54 {strides = array<i32>} : memref<16x32xf32, #tpu.memory_space<vmem>>, vector<16x8xf32>,
    %c0_38 = arith.constant 0 : index
    %c8 = arith.constant 8 : index
    %56 = vector.load %arg3[%c0_38, %c8] : memref<16x96xf32, #tpu.memory_space<vmem>>, vector<16x8xf32>
    %57 = vector.shape_cast %56 : vector<16x8xf32> to vector<2x8x8xf32>
    %c0_39 = arith.constant 0 : index
    %c40 = arith.constant 40 : index
    %58 = vector.load %arg3[%c0_39, %c40] : memref<16x96xf32, #tpu.memory_space<vmem>>, vector<16x8xf32>
    %59 = vector.shape_cast %58 : vector<16x8xf32> to vector<2x8x8xf32>
    %c0_40 = arith.constant 0 : index
    %c72 = arith.constant 72 : index
    %60 = vector.load %arg3[%c0_40, %c72] : memref<16x96xf32, #tpu.memory_space<vmem>>, vector<16x8xf32>
    %61 = vector.shape_cast %60 : vector<16x8xf32> to vector<2x8x8xf32>
    "tpu.trace_start"() <{level = 10 : i32, message = "bqd,bkd->bqk"}> : () -> ()
    %cst_41 = arith.constant dense<0.000000e+00> : vector<2x8x8xf32>
    %62 = tpu.matmul %57, %59, %cst_41 {dimension_numbers = #tpu.dot_dimension_numbers<[2], [2], [1], [1], [0, 0, 0, 1, 1, 1], [0], [0]>} : vector<2x8x8xf32>, vector<2x8x8xf32>, vector<2x8x8xf32> -> vector<2x8x8xf32>
    "tpu.trace_stop"() : () -> ()
    %cst_42 = arith.constant dense<0xFF800000> : vector<2x8xf32>
    %63 = vector.multi_reduction <maximumf>, %62, %cst_42 [2] : vector<2x8x8xf32> to vector<2x8xf32>
    %64 = vector.shape_cast %63 : vector<2x8xf32> to vector<2x8x1xf32>
    %65 = vector.broadcast %64 : vector<2x8x1xf32> to vector<2x8x8xf32>
    %66 = arith.subf %62, %65 : vector<2x8x8xf32>
    %67 = math.exp %66 : vector<2x8x8xf32>
    %cst_43 = arith.constant dense<0.000000e+00> : vector<2x8xf32>
    %68 = vector.multi_reduction <add>, %67, %cst_43 [2] : vector<2x8x8xf32> to vector<2x8xf32>
    %69 = vector.shape_cast %68 : vector<2x8xf32> to vector<2x8x1xf32>
    %70 = vector.broadcast %69 : vector<2x8x1xf32> to vector<2x8x8xf32>
    %71 = arith.divf %67, %70 : vector<2x8x8xf32>
    "tpu.trace_start"() <{level = 10 : i32, message = "bqk,bkd->bqd"}> : () -> ()
    %cst_44 = arith.constant dense<0.000000e+00> : vector<2x8x8xf32>
    %72 = tpu.matmul %71, %61, %cst_44 {dimension_numbers = #tpu.dot_dimension_numbers<[2], [1], [1], [2], [0, 0, 0, 1, 1, 2], [0], [0]>} : vector<2x8x8xf32>, vector<2x8x8xf32>, vector<2x8x8xf32> -> vector<2x8x8xf32>
    "tpu.trace_stop"() : () -> ()
    %73 = vector.shape_cast %72 : vector<2x8x8xf32> to vector<16x8xf32>
    %c0_45 = arith.constant 0 : index
    %c8_46 = arith.constant 8 : index
    %74 = vector.load %arg4[%c0_45, %c8_46] : memref<16x32xf32, #tpu.memory_space<vmem>>, vector<16x8xf32>
    tpu.vector_store %arg4[%c0_45, %c8_46], %73 {strides = array<i32>} : memref<16x32xf32, #tpu.memory_space<vmem>>, vector<16x8xf32>,
    %c0_47 = arith.constant 0 : index
    %c16 = arith.constant 16 : index
    %75 = vector.load %arg3[%c0_47, %c16] : memref<16x96xf32, #tpu.memory_space<vmem>>, vector<16x8xf32>
    %76 = vector.shape_cast %75 : vector<16x8xf32> to vector<2x8x8xf32>
    %c0_48 = arith.constant 0 : index
    %c48 = arith.constant 48 : index
    %77 = vector.load %arg3[%c0_48, %c48] : memref<16x96xf32, #tpu.memory_space<vmem>>, vector<16x8xf32>
    %78 = vector.shape_cast %77 : vector<16x8xf32> to vector<2x8x8xf32>
    %c0_49 = arith.constant 0 : index
    %c80 = arith.constant 80 : index
    %79 = vector.load %arg3[%c0_49, %c80] : memref<16x96xf32, #tpu.memory_space<vmem>>, vector<16x8xf32>
    %80 = vector.shape_cast %79 : vector<16x8xf32> to vector<2x8x8xf32>
    "tpu.trace_start"() <{level = 10 : i32, message = "bqd,bkd->bqk"}> : () -> ()
    %cst_50 = arith.constant dense<0.000000e+00> : vector<2x8x8xf32>
    %81 = tpu.matmul %76, %78, %cst_50 {dimension_numbers = #tpu.dot_dimension_numbers<[2], [2], [1], [1], [0, 0, 0, 1, 1, 1], [0], [0]>} : vector<2x8x8xf32>, vector<2x8x8xf32>, vector<2x8x8xf32> -> vector<2x8x8xf32>
    "tpu.trace_stop"() : () -> ()
    %cst_51 = arith.constant dense<0xFF800000> : vector<2x8xf32>
    %82 = vector.multi_reduction <maximumf>, %81, %cst_51 [2] : vector<2x8x8xf32> to vector<2x8xf32>
    %83 = vector.shape_cast %82 : vector<2x8xf32> to vector<2x8x1xf32>
    %84 = vector.broadcast %83 : vector<2x8x1xf32> to vector<2x8x8xf32>
    %85 = arith.subf %81, %84 : vector<2x8x8xf32>
    %86 = math.exp %85 : vector<2x8x8xf32>
    %cst_52 = arith.constant dense<0.000000e+00> : vector<2x8xf32>
    %87 = vector.multi_reduction <add>, %86, %cst_52 [2] : vector<2x8x8xf32> to vector<2x8xf32>
    %88 = vector.shape_cast %87 : vector<2x8xf32> to vector<2x8x1xf32>
    %89 = vector.broadcast %88 : vector<2x8x1xf32> to vector<2x8x8xf32>
    %90 = arith.divf %86, %89 : vector<2x8x8xf32>
    "tpu.trace_start"() <{level = 10 : i32, message = "bqk,bkd->bqd"}> : () -> ()
    %cst_53 = arith.constant dense<0.000000e+00> : vector<2x8x8xf32>
    %91 = tpu.matmul %90, %80, %cst_53 {dimension_numbers = #tpu.dot_dimension_numbers<[2], [1], [1], [2], [0, 0, 0, 1, 1, 2], [0], [0]>} : vector<2x8x8xf32>, vector<2x8x8xf32>, vector<2x8x8xf32> -> vector<2x8x8xf32>
    "tpu.trace_stop"() : () -> ()
    %92 = vector.shape_cast %91 : vector<2x8x8xf32> to vector<16x8xf32>
    %c0_54 = arith.constant 0 : index
    %c16_55 = arith.constant 16 : index
    %93 = vector.load %arg4[%c0_54, %c16_55] : memref<16x32xf32, #tpu.memory_space<vmem>>, vector<16x8xf32>
    tpu.vector_store %arg4[%c0_54, %c16_55], %92 {strides = array<i32>} : memref<16x32xf32, #tpu.memory_space<vmem>>, vector<16x8xf32>,
    %c0_56 = arith.constant 0 : index
    %c24 = arith.constant 24 : index
    %94 = vector.load %arg3[%c0_56, %c24] : memref<16x96xf32, #tpu.memory_space<vmem>>, vector<16x8xf32>
    %95 = vector.shape_cast %94 : vector<16x8xf32> to vector<2x8x8xf32>
    %c0_57 = arith.constant 0 : index
    %c56 = arith.constant 56 : index
    %96 = vector.load %arg3[%c0_57, %c56] : memref<16x96xf32, #tpu.memory_space<vmem>>, vector<16x8xf32>
    %97 = vector.shape_cast %96 : vector<16x8xf32> to vector<2x8x8xf32>
    %c0_58 = arith.constant 0 : index
    %c88 = arith.constant 88 : index
    %98 = vector.load %arg3[%c0_58, %c88] : memref<16x96xf32, #tpu.memory_space<vmem>>, vector<16x8xf32>
    %99 = vector.shape_cast %98 : vector<16x8xf32> to vector<2x8x8xf32>
    "tpu.trace_start"() <{level = 10 : i32, message = "bqd,bkd->bqk"}> : () -> ()
    %cst_59 = arith.constant dense<0.000000e+00> : vector<2x8x8xf32>
    %100 = tpu.matmul %95, %97, %cst_59 {dimension_numbers = #tpu.dot_dimension_numbers<[2], [2], [1], [1], [0, 0, 0, 1, 1, 1], [0], [0]>} : vector<2x8x8xf32>, vector<2x8x8xf32>, vector<2x8x8xf32> -> vector<2x8x8xf32>
    "tpu.trace_stop"() : () -> ()
    %cst_60 = arith.constant dense<0xFF800000> : vector<2x8xf32>
    %101 = vector.multi_reduction <maximumf>, %100, %cst_60 [2] : vector<2x8x8xf32> to vector<2x8xf32>
    %102 = vector.shape_cast %101 : vector<2x8xf32> to vector<2x8x1xf32>
    %103 = vector.broadcast %102 : vector<2x8x1xf32> to vector<2x8x8xf32>
    %104 = arith.subf %100, %103 : vector<2x8x8xf32>
    %105 = math.exp %104 : vector<2x8x8xf32>
    %cst_61 = arith.constant dense<0.000000e+00> : vector<2x8xf32>
    %106 = vector.multi_reduction <add>, %105, %cst_61 [2] : vector<2x8x8xf32> to vector<2x8xf32>
    %107 = vector.shape_cast %106 : vector<2x8xf32> to vector<2x8x1xf32>
    %108 = vector.broadcast %107 : vector<2x8x1xf32> to vector<2x8x8xf32>
    %109 = arith.divf %105, %108 : vector<2x8x8xf32>
    "tpu.trace_start"() <{level = 10 : i32, message = "bqk,bkd->bqd"}> : () -> ()
    %cst_62 = arith.constant dense<0.000000e+00> : vector<2x8x8xf32>
    %110 = tpu.matmul %109, %99, %cst_62 {dimension_numbers = #tpu.dot_dimension_numbers<[2], [1], [1], [2], [0, 0, 0, 1, 1, 2], [0], [0]>} : vector<2x8x8xf32>, vector<2x8x8xf32>, vector<2x8x8xf32> -> vector<2x8x8xf32>
    "tpu.trace_stop"() : () -> ()
    %111 = vector.shape_cast %110 : vector<2x8x8xf32> to vector<16x8xf32>
    %c0_63 = arith.constant 0 : index
    %c24_64 = arith.constant 24 : index
    %112 = vector.load %arg4[%c0_63, %c24_64] : memref<16x32xf32, #tpu.memory_space<vmem>>, vector<16x8xf32>
    tpu.vector_store %arg4[%c0_63, %c24_64], %111 {strides = array<i32>} : memref<16x32xf32, #tpu.memory_space<vmem>>, vector<16x8xf32>,
    %c0_65 = arith.constant 0 : index
    %c0_66 = arith.constant 0 : index
    %113 = vector.load %arg4[%c0_65, %c0_66] : memref<16x32xf32, #tpu.memory_space<vmem>>, vector<16x32xf32>
    %cst_67 = arith.constant dense<0.000000e+00> : vector<16x32xf32>
    %114 = tpu.matmul %113, %2, %cst_67 {dimension_numbers = #tpu.dot_dimension_numbers<[1], [0], [0], [1], [0, 0, 1, 1], [], []>} : vector<16x32xf32>, vector<32x32xf32>, vector<16x32xf32> -> vector<16x32xf32>
    %115 = vector.broadcast %10 : vector<1x32xf32> to vector<16x32xf32>
    %116 = arith.addf %114, %115 : vector<16x32xf32>
    %117 = arith.addf %116, %0 : vector<16x32xf32>
    %cst_68 = arith.constant dense<0.000000e+00> : vector<16xf32>
    %118 = vector.multi_reduction <add>, %117, %cst_68 [1] : vector<16x32xf32> to vector<16xf32>
    %119 = vector.shape_cast %118 : vector<16xf32> to vector<16x1xf32>
    %cst_69 = arith.constant 3.200000e+01 : f32
    %120 = vector.broadcast %cst_69 : f32 to vector<16x1xf32>
    %121 = arith.divf %119, %120 : vector<16x1xf32>
    %122 = vector.broadcast %121 : vector<16x1xf32> to vector<16x32xf32>
    %123 = arith.subf %117, %122 : vector<16x32xf32>
    %124 = arith.mulf %123, %123 : vector<16x32xf32>
    %cst_70 = arith.constant dense<0.000000e+00> : vector<16xf32>
    %125 = vector.multi_reduction <add>, %124, %cst_70 [1] : vector<16x32xf32> to vector<16xf32>
    %126 = vector.shape_cast %125 : vector<16xf32> to vector<16x1xf32>
    %cst_71 = arith.constant 3.200000e+01 : f32
    %127 = vector.broadcast %cst_71 : f32 to vector<16x1xf32>
    %128 = arith.divf %126, %127 : vector<16x1xf32>
    %cst_72 = arith.constant 9.99999997E-7 : f32
    %129 = vector.broadcast %cst_72 : f32 to vector<16x1xf32>
    %130 = arith.addf %128, %129 : vector<16x1xf32>
    %131 = math.rsqrt %130 : vector<16x1xf32>
    %132 = vector.broadcast %131 : vector<16x1xf32> to vector<16x32xf32>
    %133 = arith.mulf %123, %132 : vector<16x32xf32>
    %134 = vector.broadcast %7 : vector<1x32xf32> to vector<16x32xf32>
    %135 = arith.mulf %133, %134 : vector<16x32xf32>
    %136 = vector.broadcast %8 : vector<1x32xf32> to vector<16x32xf32>
    %137 = arith.addf %135, %136 : vector<16x32xf32>
    %cst_73 = arith.constant dense<0.000000e+00> : vector<16x64xf32>
    %138 = tpu.matmul %137, %3, %cst_73 {dimension_numbers = #tpu.dot_dimension_numbers<[1], [0], [0], [1], [0, 0, 1, 1], [], []>} : vector<16x32xf32>, vector<32x64xf32>, vector<16x64xf32> -> vector<16x64xf32>
    %139 = vector.broadcast %11 : vector<1x64xf32> to vector<16x64xf32>
    %140 = arith.addf %138, %139 : vector<16x64xf32>
    %cst_74 = arith.constant 5.000000e-01 : f32
    %141 = vector.broadcast %cst_74 : f32 to vector<16x64xf32>
    %142 = arith.mulf %141, %140 : vector<16x64xf32>
    %cst_75 = arith.constant 0.707106769 : f32
    %143 = vector.broadcast %cst_75 : f32 to vector<16x64xf32>
    %144 = arith.mulf %140, %143 : vector<16x64xf32>
    %145 = math.erf %144 : vector<16x64xf32>
    %cst_76 = arith.constant 1.000000e+00 : f32
    %146 = vector.broadcast %cst_76 : f32 to vector<16x64xf32>
    %147 = arith.addf %146, %145 : vector<16x64xf32>
    %148 = arith.mulf %142, %147 : vector<16x64xf32>
    %cst_77 = arith.constant dense<0.000000e+00> : vector<16x32xf32>
    %149 = tpu.matmul %148, %4, %cst_77 {dimension_numbers = #tpu.dot_dimension_numbers<[1], [0], [0], [1], [0, 0, 1, 1], [], []>} : vector<16x64xf32>, vector<64x32xf32>, vector<16x32xf32> -> vector<16x32xf32>
    %150 = vector.broadcast %12 : vector<1x32xf32> to vector<16x32xf32>
    %151 = arith.addf %149, %150 : vector<16x32xf32>
    %152 = arith.addf %151, %117 : vector<16x32xf32>
    %c128 = arith.constant 128 : index
    %c0_78 = arith.constant 0 : index
    %153 = vector.load %arg1[%c128, %c0_78] : memref<264x128xf32, #tpu.memory_space<vmem>>, vector<32x96xf32>
    %c160 = arith.constant 160 : index
    %c0_79 = arith.constant 0 : index
    %154 = vector.load %arg1[%c160, %c0_79] : memref<264x128xf32, #tpu.memory_space<vmem>>, vector<32x32xf32>
    %c160_80 = arith.constant 160 : index
    %c32_81 = arith.constant 32 : index
    %155 = vector.load %arg1[%c160_80, %c32_81] : memref<264x128xf32, #tpu.memory_space<vmem>>, vector<32x64xf32>
    %c192 = arith.constant 192 : index
    %c0_82 = arith.constant 0 : index
    %156 = vector.load %arg1[%c192, %c0_82] : memref<264x128xf32, #tpu.memory_space<vmem>>, vector<64x32xf32>
    %c259 = arith.constant 259 : index
    %c0_83 = arith.constant 0 : index
    %157 = vector.load %arg1[%c259, %c0_83] : memref<264x128xf32, #tpu.memory_space<vmem>>, vector<1x32xf32>
    %c259_84 = arith.constant 259 : index
    %c32_85 = arith.constant 32 : index
    %158 = vector.load %arg1[%c259_84, %c32_85] : memref<264x128xf32, #tpu.memory_space<vmem>>, vector<1x32xf32>
    %c259_86 = arith.constant 259 : index
    %c64_87 = arith.constant 64 : index
    %159 = vector.load %arg1[%c259_86, %c64_87] : memref<264x128xf32, #tpu.memory_space<vmem>>, vector<1x32xf32>
    %c259_88 = arith.constant 259 : index
    %c96_89 = arith.constant 96 : index
    %160 = vector.load %arg1[%c259_88, %c96_89] : memref<264x128xf32, #tpu.memory_space<vmem>>, vector<1x32xf32>
    %c260 = arith.constant 260 : index
    %c0_90 = arith.constant 0 : index
    %161 = vector.load %arg1[%c260, %c0_90] : memref<264x128xf32, #tpu.memory_space<vmem>>, vector<1x96xf32>
    %c261 = arith.constant 261 : index
    %c0_91 = arith.constant 0 : index
    %162 = vector.load %arg1[%c261, %c0_91] : memref<264x128xf32, #tpu.memory_space<vmem>>, vector<1x32xf32>
    %c261_92 = arith.constant 261 : index
    %c32_93 = arith.constant 32 : index
    %163 = vector.load %arg1[%c261_92, %c32_93] : memref<264x128xf32, #tpu.memory_space<vmem>>, vector<1x64xf32>
    %c261_94 = arith.constant 261 : index
    %c96_95 = arith.constant 96 : index
    %164 = vector.load %arg1[%c261_94, %c96_95] : memref<264x128xf32, #tpu.memory_space<vmem>>, vector<1x32xf32>
    %cst_96 = arith.constant dense<0.000000e+00> : vector<16xf32>
    %165 = vector.multi_reduction <add>, %152, %cst_96 [1] : vector<16x32xf32> to vector<16xf32>
    %166 = vector.shape_cast %165 : vector<16xf32> to vector<16x1xf32>
    %cst_97 = arith.constant 3.200000e+01 : f32
    %167 = vector.broadcast %cst_97 : f32 to vector<16x1xf32>
    %168 = arith.divf %166, %167 : vector<16x1xf32>
    %169 = vector.broadcast %168 : vector<16x1xf32> to vector<16x32xf32>
    %170 = arith.subf %152, %169 : vector<16x32xf32>
    %171 = arith.mulf %170, %170 : vector<16x32xf32>
    %cst_98 = arith.constant dense<0.000000e+00> : vector<16xf32>
    %172 = vector.multi_reduction <add>, %171, %cst_98 [1] : vector<16x32xf32> to vector<16xf32>
    %173 = vector.shape_cast %172 : vector<16xf32> to vector<16x1xf32>
    %cst_99 = arith.constant 3.200000e+01 : f32
    %174 = vector.broadcast %cst_99 : f32 to vector<16x1xf32>
    %175 = arith.divf %173, %174 : vector<16x1xf32>
    %cst_100 = arith.constant 9.99999997E-7 : f32
    %176 = vector.broadcast %cst_100 : f32 to vector<16x1xf32>
    %177 = arith.addf %175, %176 : vector<16x1xf32>
    %178 = math.rsqrt %177 : vector<16x1xf32>
    %179 = vector.broadcast %178 : vector<16x1xf32> to vector<16x32xf32>
    %180 = arith.mulf %170, %179 : vector<16x32xf32>
    %181 = vector.broadcast %157 : vector<1x32xf32> to vector<16x32xf32>
    %182 = arith.mulf %180, %181 : vector<16x32xf32>
    %183 = vector.broadcast %158 : vector<1x32xf32> to vector<16x32xf32>
    %184 = arith.addf %182, %183 : vector<16x32xf32>
    %cst_101 = arith.constant dense<0.000000e+00> : vector<16x96xf32>
    %185 = tpu.matmul %184, %153, %cst_101 {dimension_numbers = #tpu.dot_dimension_numbers<[1], [0], [0], [1], [0, 0, 1, 1], [], []>} : vector<16x32xf32>, vector<32x96xf32>, vector<16x96xf32> -> vector<16x96xf32>
    %186 = vector.broadcast %161 : vector<1x96xf32> to vector<16x96xf32>
    %187 = arith.addf %185, %186 : vector<16x96xf32>
    %c0_102 = arith.constant 0 : index
    %c0_103 = arith.constant 0 : index
    %188 = vector.load %arg3[%c0_102, %c0_103] : memref<16x96xf32, #tpu.memory_space<vmem>>, vector<16x96xf32>
    tpu.vector_store %arg3[%c0_102, %c0_103], %187 {strides = array<i32>} : memref<16x96xf32, #tpu.memory_space<vmem>>, vector<16x96xf32>,
    %c0_104 = arith.constant 0 : index
    %c0_105 = arith.constant 0 : index
    %189 = vector.load %arg3[%c0_104, %c0_105] : memref<16x96xf32, #tpu.memory_space<vmem>>, vector<16x8xf32>
    %190 = vector.shape_cast %189 : vector<16x8xf32> to vector<2x8x8xf32>
    %c0_106 = arith.constant 0 : index
    %c32_107 = arith.constant 32 : index
    %191 = vector.load %arg3[%c0_106, %c32_107] : memref<16x96xf32, #tpu.memory_space<vmem>>, vector<16x8xf32>
    %192 = vector.shape_cast %191 : vector<16x8xf32> to vector<2x8x8xf32>
    %c0_108 = arith.constant 0 : index
    %c64_109 = arith.constant 64 : index
    %193 = vector.load %arg3[%c0_108, %c64_109] : memref<16x96xf32, #tpu.memory_space<vmem>>, vector<16x8xf32>
    %194 = vector.shape_cast %193 : vector<16x8xf32> to vector<2x8x8xf32>
    "tpu.trace_start"() <{level = 10 : i32, message = "bqd,bkd->bqk"}> : () -> ()
    %cst_110 = arith.constant dense<0.000000e+00> : vector<2x8x8xf32>
    %195 = tpu.matmul %190, %192, %cst_110 {dimension_numbers = #tpu.dot_dimension_numbers<[2], [2], [1], [1], [0, 0, 0, 1, 1, 1], [0], [0]>} : vector<2x8x8xf32>, vector<2x8x8xf32>, vector<2x8x8xf32> -> vector<2x8x8xf32>
    "tpu.trace_stop"() : () -> ()
    %cst_111 = arith.constant dense<0xFF800000> : vector<2x8xf32>
    %196 = vector.multi_reduction <maximumf>, %195, %cst_111 [2] : vector<2x8x8xf32> to vector<2x8xf32>
    %197 = vector.shape_cast %196 : vector<2x8xf32> to vector<2x8x1xf32>
    %198 = vector.broadcast %197 : vector<2x8x1xf32> to vector<2x8x8xf32>
    %199 = arith.subf %195, %198 : vector<2x8x8xf32>
    %200 = math.exp %199 : vector<2x8x8xf32>
    %cst_112 = arith.constant dense<0.000000e+00> : vector<2x8xf32>
    %201 = vector.multi_reduction <add>, %200, %cst_112 [2] : vector<2x8x8xf32> to vector<2x8xf32>
    %202 = vector.shape_cast %201 : vector<2x8xf32> to vector<2x8x1xf32>
    %203 = vector.broadcast %202 : vector<2x8x1xf32> to vector<2x8x8xf32>
    %204 = arith.divf %200, %203 : vector<2x8x8xf32>
    "tpu.trace_start"() <{level = 10 : i32, message = "bqk,bkd->bqd"}> : () -> ()
    %cst_113 = arith.constant dense<0.000000e+00> : vector<2x8x8xf32>
    %205 = tpu.matmul %204, %194, %cst_113 {dimension_numbers = #tpu.dot_dimension_numbers<[2], [1], [1], [2], [0, 0, 0, 1, 1, 2], [0], [0]>} : vector<2x8x8xf32>, vector<2x8x8xf32>, vector<2x8x8xf32> -> vector<2x8x8xf32>
    "tpu.trace_stop"() : () -> ()
    %206 = vector.shape_cast %205 : vector<2x8x8xf32> to vector<16x8xf32>
    %c0_114 = arith.constant 0 : index
    %c0_115 = arith.constant 0 : index
    %207 = vector.load %arg4[%c0_114, %c0_115] : memref<16x32xf32, #tpu.memory_space<vmem>>, vector<16x8xf32>
    tpu.vector_store %arg4[%c0_114, %c0_115], %206 {strides = array<i32>} : memref<16x32xf32, #tpu.memory_space<vmem>>, vector<16x8xf32>,
    %c0_116 = arith.constant 0 : index
    %c8_117 = arith.constant 8 : index
    %208 = vector.load %arg3[%c0_116, %c8_117] : memref<16x96xf32, #tpu.memory_space<vmem>>, vector<16x8xf32>
    %209 = vector.shape_cast %208 : vector<16x8xf32> to vector<2x8x8xf32>
    %c0_118 = arith.constant 0 : index
    %c40_119 = arith.constant 40 : index
    %210 = vector.load %arg3[%c0_118, %c40_119] : memref<16x96xf32, #tpu.memory_space<vmem>>, vector<16x8xf32>
    %211 = vector.shape_cast %210 : vector<16x8xf32> to vector<2x8x8xf32>
    %c0_120 = arith.constant 0 : index
    %c72_121 = arith.constant 72 : index
    %212 = vector.load %arg3[%c0_120, %c72_121] : memref<16x96xf32, #tpu.memory_space<vmem>>, vector<16x8xf32>
    %213 = vector.shape_cast %212 : vector<16x8xf32> to vector<2x8x8xf32>
    "tpu.trace_start"() <{level = 10 : i32, message = "bqd,bkd->bqk"}> : () -> ()
    %cst_122 = arith.constant dense<0.000000e+00> : vector<2x8x8xf32>
    %214 = tpu.matmul %209, %211, %cst_122 {dimension_numbers = #tpu.dot_dimension_numbers<[2], [2], [1], [1], [0, 0, 0, 1, 1, 1], [0], [0]>} : vector<2x8x8xf32>, vector<2x8x8xf32>, vector<2x8x8xf32> -> vector<2x8x8xf32>
    "tpu.trace_stop"() : () -> ()
    %cst_123 = arith.constant dense<0xFF800000> : vector<2x8xf32>
    %215 = vector.multi_reduction <maximumf>, %214, %cst_123 [2] : vector<2x8x8xf32> to vector<2x8xf32>
    %216 = vector.shape_cast %215 : vector<2x8xf32> to vector<2x8x1xf32>
    %217 = vector.broadcast %216 : vector<2x8x1xf32> to vector<2x8x8xf32>
    %218 = arith.subf %214, %217 : vector<2x8x8xf32>
    %219 = math.exp %218 : vector<2x8x8xf32>
    %cst_124 = arith.constant dense<0.000000e+00> : vector<2x8xf32>
    %220 = vector.multi_reduction <add>, %219, %cst_124 [2] : vector<2x8x8xf32> to vector<2x8xf32>
    %221 = vector.shape_cast %220 : vector<2x8xf32> to vector<2x8x1xf32>
    %222 = vector.broadcast %221 : vector<2x8x1xf32> to vector<2x8x8xf32>
    %223 = arith.divf %219, %222 : vector<2x8x8xf32>
    "tpu.trace_start"() <{level = 10 : i32, message = "bqk,bkd->bqd"}> : () -> ()
    %cst_125 = arith.constant dense<0.000000e+00> : vector<2x8x8xf32>
    %224 = tpu.matmul %223, %213, %cst_125 {dimension_numbers = #tpu.dot_dimension_numbers<[2], [1], [1], [2], [0, 0, 0, 1, 1, 2], [0], [0]>} : vector<2x8x8xf32>, vector<2x8x8xf32>, vector<2x8x8xf32> -> vector<2x8x8xf32>
    "tpu.trace_stop"() : () -> ()
    %225 = vector.shape_cast %224 : vector<2x8x8xf32> to vector<16x8xf32>
    %c0_126 = arith.constant 0 : index
    %c8_127 = arith.constant 8 : index
    %226 = vector.load %arg4[%c0_126, %c8_127] : memref<16x32xf32, #tpu.memory_space<vmem>>, vector<16x8xf32>
    tpu.vector_store %arg4[%c0_126, %c8_127], %225 {strides = array<i32>} : memref<16x32xf32, #tpu.memory_space<vmem>>, vector<16x8xf32>,
    %c0_128 = arith.constant 0 : index
    %c16_129 = arith.constant 16 : index
    %227 = vector.load %arg3[%c0_128, %c16_129] : memref<16x96xf32, #tpu.memory_space<vmem>>, vector<16x8xf32>
    %228 = vector.shape_cast %227 : vector<16x8xf32> to vector<2x8x8xf32>
    %c0_130 = arith.constant 0 : index
    %c48_131 = arith.constant 48 : index
    %229 = vector.load %arg3[%c0_130, %c48_131] : memref<16x96xf32, #tpu.memory_space<vmem>>, vector<16x8xf32>
    %230 = vector.shape_cast %229 : vector<16x8xf32> to vector<2x8x8xf32>
    %c0_132 = arith.constant 0 : index
    %c80_133 = arith.constant 80 : index
    %231 = vector.load %arg3[%c0_132, %c80_133] : memref<16x96xf32, #tpu.memory_space<vmem>>, vector<16x8xf32>
    %232 = vector.shape_cast %231 : vector<16x8xf32> to vector<2x8x8xf32>
    "tpu.trace_start"() <{level = 10 : i32, message = "bqd,bkd->bqk"}> : () -> ()
    %cst_134 = arith.constant dense<0.000000e+00> : vector<2x8x8xf32>
    %233 = tpu.matmul %228, %230, %cst_134 {dimension_numbers = #tpu.dot_dimension_numbers<[2], [2], [1], [1], [0, 0, 0, 1, 1, 1], [0], [0]>} : vector<2x8x8xf32>, vector<2x8x8xf32>, vector<2x8x8xf32> -> vector<2x8x8xf32>
    "tpu.trace_stop"() : () -> ()
    %cst_135 = arith.constant dense<0xFF800000> : vector<2x8xf32>
    %234 = vector.multi_reduction <maximumf>, %233, %cst_135 [2] : vector<2x8x8xf32> to vector<2x8xf32>
    %235 = vector.shape_cast %234 : vector<2x8xf32> to vector<2x8x1xf32>
    %236 = vector.broadcast %235 : vector<2x8x1xf32> to vector<2x8x8xf32>
    %237 = arith.subf %233, %236 : vector<2x8x8xf32>
    %238 = math.exp %237 : vector<2x8x8xf32>
    %cst_136 = arith.constant dense<0.000000e+00> : vector<2x8xf32>
    %239 = vector.multi_reduction <add>, %238, %cst_136 [2] : vector<2x8x8xf32> to vector<2x8xf32>
    %240 = vector.shape_cast %239 : vector<2x8xf32> to vector<2x8x1xf32>
    %241 = vector.broadcast %240 : vector<2x8x1xf32> to vector<2x8x8xf32>
    %242 = arith.divf %238, %241 : vector<2x8x8xf32>
    "tpu.trace_start"() <{level = 10 : i32, message = "bqk,bkd->bqd"}> : () -> ()
    %cst_137 = arith.constant dense<0.000000e+00> : vector<2x8x8xf32>
    %243 = tpu.matmul %242, %232, %cst_137 {dimension_numbers = #tpu.dot_dimension_numbers<[2], [1], [1], [2], [0, 0, 0, 1, 1, 2], [0], [0]>} : vector<2x8x8xf32>, vector<2x8x8xf32>, vector<2x8x8xf32> -> vector<2x8x8xf32>
    "tpu.trace_stop"() : () -> ()
    %244 = vector.shape_cast %243 : vector<2x8x8xf32> to vector<16x8xf32>
    %c0_138 = arith.constant 0 : index
    %c16_139 = arith.constant 16 : index
    %245 = vector.load %arg4[%c0_138, %c16_139] : memref<16x32xf32, #tpu.memory_space<vmem>>, vector<16x8xf32>
    tpu.vector_store %arg4[%c0_138, %c16_139], %244 {strides = array<i32>} : memref<16x32xf32, #tpu.memory_space<vmem>>, vector<16x8xf32>,
    %c0_140 = arith.constant 0 : index
    %c24_141 = arith.constant 24 : index
    %246 = vector.load %arg3[%c0_140, %c24_141] : memref<16x96xf32, #tpu.memory_space<vmem>>, vector<16x8xf32>
    %247 = vector.shape_cast %246 : vector<16x8xf32> to vector<2x8x8xf32>
    %c0_142 = arith.constant 0 : index
    %c56_143 = arith.constant 56 : index
    %248 = vector.load %arg3[%c0_142, %c56_143] : memref<16x96xf32, #tpu.memory_space<vmem>>, vector<16x8xf32>
    %249 = vector.shape_cast %248 : vector<16x8xf32> to vector<2x8x8xf32>
    %c0_144 = arith.constant 0 : index
    %c88_145 = arith.constant 88 : index
    %250 = vector.load %arg3[%c0_144, %c88_145] : memref<16x96xf32, #tpu.memory_space<vmem>>, vector<16x8xf32>
    %251 = vector.shape_cast %250 : vector<16x8xf32> to vector<2x8x8xf32>
    "tpu.trace_start"() <{level = 10 : i32, message = "bqd,bkd->bqk"}> : () -> ()
    %cst_146 = arith.constant dense<0.000000e+00> : vector<2x8x8xf32>
    %252 = tpu.matmul %247, %249, %cst_146 {dimension_numbers = #tpu.dot_dimension_numbers<[2], [2], [1], [1], [0, 0, 0, 1, 1, 1], [0], [0]>} : vector<2x8x8xf32>, vector<2x8x8xf32>, vector<2x8x8xf32> -> vector<2x8x8xf32>
    "tpu.trace_stop"() : () -> ()
    %cst_147 = arith.constant dense<0xFF800000> : vector<2x8xf32>
    %253 = vector.multi_reduction <maximumf>, %252, %cst_147 [2] : vector<2x8x8xf32> to vector<2x8xf32>
    %254 = vector.shape_cast %253 : vector<2x8xf32> to vector<2x8x1xf32>
    %255 = vector.broadcast %254 : vector<2x8x1xf32> to vector<2x8x8xf32>
    %256 = arith.subf %252, %255 : vector<2x8x8xf32>
    %257 = math.exp %256 : vector<2x8x8xf32>
    %cst_148 = arith.constant dense<0.000000e+00> : vector<2x8xf32>
    %258 = vector.multi_reduction <add>, %257, %cst_148 [2] : vector<2x8x8xf32> to vector<2x8xf32>
    %259 = vector.shape_cast %258 : vector<2x8xf32> to vector<2x8x1xf32>
    %260 = vector.broadcast %259 : vector<2x8x1xf32> to vector<2x8x8xf32>
    %261 = arith.divf %257, %260 : vector<2x8x8xf32>
    "tpu.trace_start"() <{level = 10 : i32, message = "bqk,bkd->bqd"}> : () -> ()
    %cst_149 = arith.constant dense<0.000000e+00> : vector<2x8x8xf32>
    %262 = tpu.matmul %261, %251, %cst_149 {dimension_numbers = #tpu.dot_dimension_numbers<[2], [1], [1], [2], [0, 0, 0, 1, 1, 2], [0], [0]>} : vector<2x8x8xf32>, vector<2x8x8xf32>, vector<2x8x8xf32> -> vector<2x8x8xf32>
    "tpu.trace_stop"() : () -> ()
    %263 = vector.shape_cast %262 : vector<2x8x8xf32> to vector<16x8xf32>
    %c0_150 = arith.constant 0 : index
    %c24_151 = arith.constant 24 : index
    %264 = vector.load %arg4[%c0_150, %c24_151] : memref<16x32xf32, #tpu.memory_space<vmem>>, vector<16x8xf32>
    tpu.vector_store %arg4[%c0_150, %c24_151], %263 {strides = array<i32>} : memref<16x32xf32, #tpu.memory_space<vmem>>, vector<16x8xf32>,
    %c0_152 = arith.constant 0 : index
    %c0_153 = arith.constant 0 : index
    %265 = vector.load %arg4[%c0_152, %c0_153] : memref<16x32xf32, #tpu.memory_space<vmem>>, vector<16x32xf32>
    %cst_154 = arith.constant dense<0.000000e+00> : vector<16x32xf32>
    %266 = tpu.matmul %265, %154, %cst_154 {dimension_numbers = #tpu.dot_dimension_numbers<[1], [0], [0], [1], [0, 0, 1, 1], [], []>} : vector<16x32xf32>, vector<32x32xf32>, vector<16x32xf32> -> vector<16x32xf32>
    %267 = vector.broadcast %162 : vector<1x32xf32> to vector<16x32xf32>
    %268 = arith.addf %266, %267 : vector<16x32xf32>
    %269 = arith.addf %268, %152 : vector<16x32xf32>
    %cst_155 = arith.constant dense<0.000000e+00> : vector<16xf32>
    %270 = vector.multi_reduction <add>, %269, %cst_155 [1] : vector<16x32xf32> to vector<16xf32>
    %271 = vector.shape_cast %270 : vector<16xf32> to vector<16x1xf32>
    %cst_156 = arith.constant 3.200000e+01 : f32
    %272 = vector.broadcast %cst_156 : f32 to vector<16x1xf32>
    %273 = arith.divf %271, %272 : vector<16x1xf32>
    %274 = vector.broadcast %273 : vector<16x1xf32> to vector<16x32xf32>
    %275 = arith.subf %269, %274 : vector<16x32xf32>
    %276 = arith.mulf %275, %275 : vector<16x32xf32>
    %cst_157 = arith.constant dense<0.000000e+00> : vector<16xf32>
    %277 = vector.multi_reduction <add>, %276, %cst_157 [1] : vector<16x32xf32> to vector<16xf32>
    %278 = vector.shape_cast %277 : vector<16xf32> to vector<16x1xf32>
    %cst_158 = arith.constant 3.200000e+01 : f32
    %279 = vector.broadcast %cst_158 : f32 to vector<16x1xf32>
    %280 = arith.divf %278, %279 : vector<16x1xf32>
    %cst_159 = arith.constant 9.99999997E-7 : f32
    %281 = vector.broadcast %cst_159 : f32 to vector<16x1xf32>
    %282 = arith.addf %280, %281 : vector<16x1xf32>
    %283 = math.rsqrt %282 : vector<16x1xf32>
    %284 = vector.broadcast %283 : vector<16x1xf32> to vector<16x32xf32>
    %285 = arith.mulf %275, %284 : vector<16x32xf32>
    %286 = vector.broadcast %159 : vector<1x32xf32> to vector<16x32xf32>
    %287 = arith.mulf %285, %286 : vector<16x32xf32>
    %288 = vector.broadcast %160 : vector<1x32xf32> to vector<16x32xf32>
    %289 = arith.addf %287, %288 : vector<16x32xf32>
    %cst_160 = arith.constant dense<0.000000e+00> : vector<16x64xf32>
    %290 = tpu.matmul %289, %155, %cst_160 {dimension_numbers = #tpu.dot_dimension_numbers<[1], [0], [0], [1], [0, 0, 1, 1], [], []>} : vector<16x32xf32>, vector<32x64xf32>, vector<16x64xf32> -> vector<16x64xf32>
    %291 = vector.broadcast %163 : vector<1x64xf32> to vector<16x64xf32>
    %292 = arith.addf %290, %291 : vector<16x64xf32>
    %cst_161 = arith.constant 5.000000e-01 : f32
    %293 = vector.broadcast %cst_161 : f32 to vector<16x64xf32>
    %294 = arith.mulf %293, %292 : vector<16x64xf32>
    %cst_162 = arith.constant 0.707106769 : f32
    %295 = vector.broadcast %cst_162 : f32 to vector<16x64xf32>
    %296 = arith.mulf %292, %295 : vector<16x64xf32>
    %297 = math.erf %296 : vector<16x64xf32>
    %cst_163 = arith.constant 1.000000e+00 : f32
    %298 = vector.broadcast %cst_163 : f32 to vector<16x64xf32>
    %299 = arith.addf %298, %297 : vector<16x64xf32>
    %300 = arith.mulf %294, %299 : vector<16x64xf32>
    %cst_164 = arith.constant dense<0.000000e+00> : vector<16x32xf32>
    %301 = tpu.matmul %300, %156, %cst_164 {dimension_numbers = #tpu.dot_dimension_numbers<[1], [0], [0], [1], [0, 0, 1, 1], [], []>} : vector<16x64xf32>, vector<64x32xf32>, vector<16x32xf32> -> vector<16x32xf32>
    %302 = vector.broadcast %164 : vector<1x32xf32> to vector<16x32xf32>
    %303 = arith.addf %301, %302 : vector<16x32xf32>
    %304 = arith.addf %303, %269 : vector<16x32xf32>
    %c262 = arith.constant 262 : index
    %c0_165 = arith.constant 0 : index
    %305 = vector.load %arg1[%c262, %c0_165] : memref<264x128xf32, #tpu.memory_space<vmem>>, vector<1x32xf32>
    %c262_166 = arith.constant 262 : index
    %c32_167 = arith.constant 32 : index
    %306 = vector.load %arg1[%c262_166, %c32_167] : memref<264x128xf32, #tpu.memory_space<vmem>>, vector<1x32xf32>
    %cst_168 = arith.constant dense<0.000000e+00> : vector<16xf32>
    %307 = vector.multi_reduction <add>, %304, %cst_168 [1] : vector<16x32xf32> to vector<16xf32>
    %308 = vector.shape_cast %307 : vector<16xf32> to vector<16x1xf32>
    %cst_169 = arith.constant 3.200000e+01 : f32
    %309 = vector.broadcast %cst_169 : f32 to vector<16x1xf32>
    %310 = arith.divf %308, %309 : vector<16x1xf32>
    %311 = vector.broadcast %310 : vector<16x1xf32> to vector<16x32xf32>
    %312 = arith.subf %304, %311 : vector<16x32xf32>
    %313 = arith.mulf %312, %312 : vector<16x32xf32>
    %cst_170 = arith.constant dense<0.000000e+00> : vector<16xf32>
    %314 = vector.multi_reduction <add>, %313, %cst_170 [1] : vector<16x32xf32> to vector<16xf32>
    %315 = vector.shape_cast %314 : vector<16xf32> to vector<16x1xf32>
    %cst_171 = arith.constant 3.200000e+01 : f32
    %316 = vector.broadcast %cst_171 : f32 to vector<16x1xf32>
    %317 = arith.divf %315, %316 : vector<16x1xf32>
    %cst_172 = arith.constant 9.99999997E-7 : f32
    %318 = vector.broadcast %cst_172 : f32 to vector<16x1xf32>
    %319 = arith.addf %317, %318 : vector<16x1xf32>
    %320 = math.rsqrt %319 : vector<16x1xf32>
    %321 = vector.broadcast %320 : vector<16x1xf32> to vector<16x32xf32>
    %322 = arith.mulf %312, %321 : vector<16x32xf32>
    %323 = vector.broadcast %305 : vector<1x32xf32> to vector<16x32xf32>
    %324 = arith.mulf %322, %323 : vector<16x32xf32>
    %325 = vector.broadcast %306 : vector<1x32xf32> to vector<16x32xf32>
    %326 = arith.addf %324, %325 : vector<16x32xf32>
    %c0_173 = arith.constant 0 : index
    %c0_174 = arith.constant 0 : index
    %327 = vector.load %arg2[%c0_173, %c0_174] : memref<16x32xf32, #tpu.memory_space<vmem>>, vector<16x32xf32>
    tpu.vector_store %arg2[%c0_173, %c0_174], %326 {strides = array<i32>} : memref<16x32xf32, #tpu.memory_space<vmem>>, vector<16x32xf32>,
    return
  }
}

</mosaic_0001>

<bundles_post_ra>
// kernel: tpu_custom_call.1
= control target key start
LH: loop header
LB: loop body
LE: loop exit
PB: predicated region body
PF: predicated region fallthrough
CT: control target
= control target key end

     0   :  { %7 = vsyncpa [#allocation5], 0  ;;  %s3100_s0 = inlined_call_operand.hbm [shape: f32[16,32], index: 0, kind: input, shape index: {}]   ;;  %s3101_s1 = inlined_call_operand.hbm [shape: f32[264,128], index: 1, kind: input, shape index: {}]   ;;  %s3102_s2 = inlined_call_operand.hbm [shape: f32[16,32], index: 2, kind: output, shape index: {}]  }
   0x1   :  { %8 = vsyncpa [#allocation8], 0 }
   0x2   :  { %9 = vsyncpa [#allocation6], 0  ;;  %s14_s11 = sshll.u32 %s3100_s0, 4  ;;  %s2510_s12 = smov [#allocation4]   ;;  %s15_s11 = int_to_ptr.hbm [resolvable:$true] %s14_s11 }
   0x3   :  { %s16_s13 = sshll.u32 %s2510_s12, 4  ;;  %s27_s16 = sshll.u32 %s3101_s1, 4  ;;  %s17_s13 = int_to_ptr.vmem [resolvable:$true] %s16_s13  ;;  %s28_s16 = int_to_ptr.hbm [resolvable:$true] %s27_s16 }
   0x4   :  { %s2511_s17 = smov 128   ;;  %s2512_s18 = smov 8  }
   0x5   :  { %22 = dma.hbm_to_vmem [thread:$0]  %s15_s11, 256, %s17_s13, [#allocation5], %s2511_s17, %s2511_s17, %s2512_s18  }
   0x6   :  { %s2513_s19 = smov [#allocation7]  }
   0x7   :  { %s29_s20 = sshll.u32 %s2513_s19, 4  ;;  %s30_s20 = int_to_ptr.vmem [resolvable:$true] %s29_s20 }
   0x8   :  { %35 = dma.hbm_to_vmem [thread:$0]  %s28_s16, 4224, %s30_s20, [#allocation8], %s2511_s17, %s2511_s17, %s2512_s18  }
   0x9   :  { %2504 = dma.done.wait [#allocation5], 256  }
   0xa   :  { %2505 = vsyncadd [#allocation5], 4294967040 }
   0xb   :  { %2506 = dma.done.wait [#allocation8], 4224  }
   0xc   :  { %2507 = vsyncadd [#allocation8], 4294963072  ;;  %vm65_vm0 = vcmask 261120   ;;  %v2557_v0 = vld [vmem:[#allocation4] sm:$0xff]  ;;  %v2561_v2 = vld [vmem:[#allocation4 + $0x8] sm:$0xff]  ;;  %v2514_v4 = vmov 32.0  }
   0xd   :  { %v66_v1 = vsel %vm65_vm0, %v2557_v0, 0.0  ;;  %v69_v3 = vsel %vm65_vm0, %v2561_v2, 0.0  ;;  %2338 = vrcp.f32 %v2514_v4  ;;  %v2565_v7 = vld [vmem:[#allocation7 + $0x100] ss:$0 sm:$0xff]  ;;  %s2515_s0 = smov 96   ;;  %v49_v22 = vld [vmem:[#allocation7 + $0x18] sm:$0xff] }
   0xe   :  { %67 = vadd.xlane.f32.xlu0 %v66_v1  ;;  %121 = vrot.lane.b32.xlu2 %v2565_v7, %s2515_s0  ;;  %v48_v23 = vld [vmem:[#allocation7 + $0x10] sm:$0xff]  ;;  %v47_v24 = vld [vmem:[#allocation7 + $0x8] sm:$0xff]  ;;  %v46_v25 = vld [vmem:[#allocation7] sm:$0xff]  ;;  %vm156_vm8 = vcmask 785408   ;;  %s2516_s1 = smov 88   ;;  %s2517_s21 = smov 80  }
   0xf   :  { %145 = vmatpush.msra.mxu0 %v49_v22  ;;  %v2332_v53 = vld [vmem:[#allocation7 + $0x101] ss:$0 sm:$0xff]  ;;  %s2518_s22 = smov 72   ;;  %s2519_s23 = smov 120   ;;  %vm164_vm9 = vcmask 64512  }
  0x10   :  { %s2520_s24 = smov 112   ;;  %s2521_s25 = smov 104  }
  0x11   :  { %146 = vmatpush.msra.mxu0 %v48_v23  ;;  %s2522_s26 = smov 56   ;;  %s2523_s27 = smov 64  }
  0x12   :  { %s2524_s28 = smov 48   ;;  %s2525_s29 = smov 40  }
  0x13   :  { %v2339_v5 = vpop.eup %2338  ;;  %147 = vmatpush.msra.mxu0 %v47_v24  ;;  %s2526_s30 = smov 16   ;;  %s2527_s3 = smov 24  }
  0x14   :  { %v73_v6 = vmul.f32 32.0, %v2339_v5  ;;  %vm77_vm1 = vweird.f32 %v2339_v5  ;;  %s2528_s4 = smov 32   ;;  %s2529_s5 = smov [#allocation9]  }
  0x15   :  { %148 = vmatpush.msra.mxu0 %v46_v25  ;;  %s2182_s6 = sshll.u32 %s2529_s5, 4  ;;  %s2184_s9 = sshll.u32 %s3102_s2, 4  ;;  %s2183_s6 = int_to_ptr.vmem [resolvable:$true] %s2182_s6  ;;  %s2185_s9 = int_to_ptr.hbm [resolvable:$true] %s2184_s9 }
  0x16   :  { %70 = vadd.xlane.f32.xlu0 %v69_v3  ;;  %v74_v8 = vsub.f32 1.0, %v73_v6 }
  0x18   :  { %v75_v9 = vmul.f32 %v2339_v5, %v74_v8 }
  0x1a   :  { %v76_v10 = vadd.f32 %v2339_v5, %v75_v9 }
  0x1c   :  { %v2569_v11 = vsel %vm77_vm1, %v2339_v5, %v76_v10 }
  0x68   :  { %v122_v44 = vpop.permute.xlu2 %121 }
  0x81   :  { %v68_v12 = vpop.xlane.xlu0 %67 }
  0x82   :  { %v79_v13 = vmul.f32 %v2569_v11, %v68_v12 }
  0x84   :  { %v81_v14 = vsub.f32 %v2557_v0, %v79_v13 }
  0x86   :  { %v83_v15 = vmul.f32 %v81_v14, %v81_v14 }
  0x88   :  { %v85_v16 = vsel %vm65_vm0, %v83_v15, 0.0 }
  0x89   :  { %86 = vadd.xlane.f32.xlu1 %v85_v16  ;;  %v71_v17 = vpop.xlane.xlu0 %70 }
  0x8a   :  { %v80_v18 = vmul.f32 %v2569_v11, %v71_v17 }
  0x8c   :  { %v82_v19 = vsub.f32 %v2561_v2, %v80_v18 }
  0x8e   :  { %v84_v20 = vmul.f32 %v82_v19, %v82_v19 }
  0x90   :  { %v88_v21 = vsel %vm65_vm0, %v84_v20, 0.0 }
  0x91   :  { %89 = vadd.xlane.f32.xlu1 %v88_v21 }
  0xfc   :  { %v87_v26 = vpop.xlane.xlu1 %86 }
  0xfd   :  { %v91_v27 = vmul.f32 %v87_v26, %v2569_v11 }
  0xff   :  { %v93_v28 = vadd.f32 1e-06, %v91_v27 }
 0x101   :  { %2340 = vrsqrt.f32 %v93_v28  ;;  %vm101_vm3 = vweird.f32 %v93_v28 }
 0x104   :  { %v90_v29 = vpop.xlane.xlu1 %89 }
 0x105   :  { %v92_v30 = vmul.f32 %v90_v29, %v2569_v11 }
 0x107   :  { %v2341_v31 = vpop.eup %2340  ;;  %v94_v32 = vadd.f32 1e-06, %v92_v30 }
 0x108   :  { %v96_v33 = vmul.f32 %v2341_v31, %v93_v28  ;;  %vm102_vm2 = vweird.f32 %v2341_v31 }
 0x109   :  { %2342 = vrsqrt.f32 %v94_v32  ;;  %vm103_vm4 = vmor %vm101_vm3, %vm102_vm2  ;;  %vm111_vm6 = vweird.f32 %v94_v32 }
 0x10a   :  { %v97_v34 = vmul.f32 %v2341_v31, %v96_v33 }
 0x10c   :  { %v98_v35 = vmul.f32 0.5, %v97_v34 }
 0x10e   :  { %v99_v36 = vsub.f32 1.5, %v98_v35 }
 0x10f   :  { %v2343_v37 = vpop.eup %2342 }
 0x110   :  { %v100_v38 = vmul.f32 %v2341_v31, %v99_v36  ;;  %v106_v39 = vmul.f32 %v2343_v37, %v94_v32  ;;  %vm112_vm5 = vweird.f32 %v2343_v37 }
 0x111   :  { %vm113_vm7 = vmor %vm111_vm6, %vm112_vm5 }
 0x112   :  { %v107_v40 = vmul.f32 %v2343_v37, %v106_v39  ;;  %v104_v41 = vsel %vm103_vm4, %v2341_v31, %v100_v38 }
 0x113   :  { %v115_v42 = vmul.f32 %v104_v41, %v81_v14 }
 0x114   :  { %v108_v43 = vmul.f32 0.5, %v107_v40 }
 0x115   :  { %v118_v45 = vmul.f32 %v2565_v7, %v115_v42 }
 0x116   :  { %v109_v46 = vsub.f32 1.5, %v108_v43 }
 0x117   :  { %v124_v47 = vadd.f32 %v122_v44, %v118_v45 }
 0x118   :  { %v110_v48 = vmul.f32 %v2343_v37, %v109_v46 }
 0x119   :  { %2198 = vmatmul.msk.f32.vlgmr.msra.gmra.mxu0 %vm65_vm0, %v124_v47 }
 0x11a   :  { %v114_v49 = vsel %vm113_vm7, %v2343_v37, %v110_v48 }
 0x11b   :  { %v116_v50 = vmul.f32 %v114_v49, %v82_v19 }
 0x11d   :  { %v119_v51 = vmul.f32 %v2565_v7, %v116_v50 }
 0x11f   :  { %v125_v52 = vadd.f32 %v122_v44, %v119_v51 }
 0x121   :  { %2199 = vmatmul.msk.f32.gmra.mxu0 %vm65_vm0, %v125_v52 }
 0x196   :  { %v150_v54 = vpop.f32.mrf.mxu0 }
 0x197   :  { %v151_v55 = vadd.f32 %v2332_v53, %v150_v54 }
 0x199   :  { %157 = vst.msk [vmem:[#allocation2] sm:$0xff] %vm156_vm8, %v151_v55 }
 0x19e   :  { %v153_v56 = vpop.f32.mrf.mxu0 }
 0x19f   :  { %v154_v57 = vadd.f32 %v2332_v53, %v153_v56 }
 0x1a0   :  { %v2584_v58 = vld [vmem:[#allocation2] sm:$0xff] }
 0x1a1   :  { %158 = vst.msk [vmem:[#allocation2 + $0x8] sm:$0xff] %vm156_vm8, %v154_v57  ;;  %162 = vrot.lane.b32.xlu2 %v2584_v58, %s2515_s0 }
 0x1a8   :  { %v2589_v59 = vld [vmem:[#allocation2 + $0x8] sm:$0xff] }
 0x1a9   :  { %323 = vrot.lane.b32.xlu2 %v2584_v58, %s2516_s1  ;;  %352 = vrot.lane.b32.xlu1 %v2589_v59, %s2516_s1  ;;  %v2286_v30 = vpack.i.bf16 %v2589_v59, %v2584_v58 }
 0x1aa   :  { %190 = vrot.lane.b32.xlu0 %v2589_v59, %s2515_s0 }
 0x1b1   :  { %494 = vrot.lane.b32.xlu2 %v2584_v58, %s2517_s21  ;;  %665 = vrot.lane.b32.xlu1 %v2584_v58, %s2518_s22 }
 0x1b2   :  { %321 = vrot.lane.b32.xlu0 %v2584_v58, %s2519_s23 }
 0x1b9   :  { %350 = vrot.lane.b32.xlu2 %v2589_v59, %s2519_s23  ;;  %521 = vrot.lane.b32.xlu1 %v2589_v59, %s2520_s24 }
 0x1ba   :  { %663 = vrot.lane.b32.xlu0 %v2584_v58, %s2521_s25 }
 0x1c1   :  { %492 = vrot.lane.b32.xlu2 %v2584_v58, %s2520_s24 }
 0x1c2   :  { %694 = vrot.lane.b32.xlu0 %v2589_v59, %s2518_s22 }
 0x1c9   :  { %523 = vrot.lane.b32.xlu2 %v2589_v59, %s2517_s21 }
 0x1d1   :  { %692 = vrot.lane.b32.xlu2 %v2589_v59, %s2521_s25 }
 0x1fb   :  { %v163_v60 = vpop.permute.xlu2 %162 }
 0x1fc   :  { %2200 = vmatpush.xpose.msk.msra.mxu2 %vm164_vm9, %v163_v60 }
 0x1ff   :  { %2201 = vmatmul.msk.f32.vlgmr.msra.gmra.mxu2 %vm164_vm9, %v2584_v58 }
 0x203   :  { %v324_v61 = vpop.permute.xlu2 %323 }
 0x204   :  { %2206 = vmatpush.xpose.msk.msra.mxu1 %vm164_vm9, %v324_v61 }
 0x20b   :  { %v495_v62 = vpop.permute.xlu2 %494 }
 0x213   :  { %v351_v63 = vpop.permute.xlu2 %350 }
 0x21b   :  { %v493_v1 = vpop.permute.xlu2 %492  ;;  %v353_v3 = vpop.permute.xlu1 %352 }
 0x21c   :  { %v191_v4 = vpop.permute.xlu0 %190 }
 0x21d   :  { %2202 = vmatpush.xpose.msk.msrb.mxu2 %vm164_vm9, %v191_v4 }
 0x220   :  { %2203 = vmatmul.msk.f32.vlgmr.msrb.gmra.mxu2 %vm164_vm9, %v2589_v59 }
 0x221   :  { %2208 = vmatpush.xpose.msk.msra.mxu2 %vm164_vm9, %v353_v3 }
 0x223   :  { %v524_v5 = vpop.permute.xlu2 %523  ;;  %v666_v6 = vpop.permute.xlu1 %665 }
 0x224   :  { %v322_v8 = vpop.permute.xlu0 %321  ;;  %2214 = vmatpush.xpose.msk.msrb.mxu0 %vm164_vm9, %v524_v5 }
 0x225   :  { %2212 = vmatpush.xpose.msk.msrb.mxu2 %vm164_vm9, %v495_v62  ;;  %2207 = vmatmul.msk.f32.vlgmr.msra.gmra.mxu1 %vm164_vm9, %v322_v8 }
 0x228   :  { %2209 = vmatmul.msk.f32.vlgmr.msra.gmra.mxu2 %vm164_vm9, %v351_v63 }
 0x229   :  { %2218 = vmatpush.xpose.msk.msra.mxu2 %vm164_vm9, %v666_v6 }
 0x22b   :  { %v522_v9 = vpop.permute.xlu1 %521  ;;  %v693_v13 = vpop.permute.xlu2 %692 }
 0x22c   :  { %v664_v10 = vpop.permute.xlu0 %663  ;;  %2215 = vmatmul.msk.f32.vlgmr.msrb.gmra.mxu0 %vm164_vm9, %v522_v9 }
 0x230   :  { %2213 = vmatmul.msk.f32.vlgmr.msrb.gmra.mxu2 %vm164_vm9, %v493_v1 }
 0x234   :  { %v695_v12 = vpop.permute.xlu0 %694 }
 0x235   :  { %2220 = vmatpush.xpose.msk.msra.mxu0 %vm164_vm9, %v695_v12 }
 0x238   :  { %2219 = vmatmul.msk.f32.vlgmr.msra.gmra.mxu2 %vm164_vm9, %v664_v10  ;;  %2221 = vmatmul.msk.f32.vlgmr.msra.gmra.mxu0 %vm164_vm9, %v693_v13 }
 0x282   :  { %v186_v14 = vpop.f32.mrf.mxu2 }
 0x283   :  { %v216_v15 = vsel %vm164_vm9, %v186_v14, -inf }
 0x284   :  { %217 = vmax.xlane.f32.xlu1 %v216_v15 }
 0x2a2   :  { %v346_v16 = vpop.f32.mrf.mxu1 }
 0x2a3   :  { %v213_v17 = vpop.f32.mrf.mxu2  ;;  %v378_v18 = vsel %vm164_vm9, %v346_v16, -inf }
 0x2a4   :  { %379 = vmax.xlane.f32.xlu2 %v378_v18  ;;  %v219_v19 = vsel %vm164_vm9, %v213_v17, -inf }
 0x2a5   :  { %220 = vmax.xlane.f32.xlu0 %v219_v19 }
 0x2a9   :  { %v546_v22 = vpop.f32.mrf.mxu0 }
 0x2aa   :  { %v552_v28 = vsel %vm164_vm9, %v546_v22, -inf }
 0x2ab   :  { %v375_v20 = vpop.f32.mrf.mxu2 }
 0x2ac   :  { %v381_v21 = vsel %vm164_vm9, %v375_v20, -inf }
 0x2ad   :  { %382 = vmax.xlane.f32.xlu0 %v381_v21 }
 0x2b3   :  { %v2639_v23 = vpop.f32.mrf.mxu2 }
 0x2b4   :  { %v549_v24 = vsel %vm164_vm9, %v2639_v23, -inf }
 0x2b5   :  { %550 = vmax.xlane.f32.xlu1 %v549_v24  ;;  %v717_v25 = vpop.f32.mrf.mxu0 }
 0x2b6   :  { %v723_v26 = vsel %vm164_vm9, %v717_v25, -inf }
 0x2b7   :  { %724 = vmax.xlane.f32.xlu0 %v723_v26 }
 0x2bb   :  { %v2644_v27 = vpop.f32.mrf.mxu2 }
 0x2bc   :  { %v720_v29 = vsel %vm164_vm9, %v2644_v27, -inf }
 0x2bd   :  { %553 = vmax.xlane.f32.xlu1 %v552_v28  ;;  %721 = vmax.xlane.f32.xlu2 %v720_v29 }
 0x2cb   :  { %426 = vrot.lane.b32.xlu0 %v2584_v58, %s2522_s26 }
 0x2d5   :  { %2287 = vrot.lane.b32.xlu2 %v2286_v30, %s2523_s27 }
 0x2f7   :  { %v218_v31 = vpop.xlane.xlu1 %217 }
 0x2f8   :  { %v222_v32 = vsub.f32 %v186_v14, %v218_v31 }
 0x2fa   :  { %v224_v33 = vmul.f32 1.442695, %v222_v32 }
 0x2fc   :  { %2344 = vpow2.f32 %v224_v33 }
 0x302   :  { %v2654_v34 = vpop.eup %2344 }
 0x303   :  { %v228_v35 = vsel %vm164_vm9, %v2654_v34, 0.0 }
 0x304   :  { %229 = vadd.xlane.f32.xlu2 %v228_v35 }
 0x317   :  { %v380_v36 = vpop.xlane.xlu2 %379 }
 0x318   :  { %v384_v37 = vsub.f32 %v346_v16, %v380_v36  ;;  %v221_v38 = vpop.xlane.xlu0 %220 }
 0x319   :  { %v223_v51 = vsub.f32 %v213_v17, %v221_v38 }
 0x31a   :  { %v386_v39 = vmul.f32 1.442695, %v384_v37 }
 0x31b   :  { %v226_v53 = vmul.f32 1.442695, %v223_v51 }
 0x31c   :  { %2346 = vpow2.f32 %v386_v39  ;;  %597 = vrot.lane.b32.xlu2 %v2584_v58, %s2524_s28 }
 0x320   :  { %v383_v40 = vpop.xlane.xlu0 %382 }
 0x321   :  { %v385_v41 = vsub.f32 %v375_v20, %v383_v40 }
 0x322   :  { %v2660_v42 = vpop.eup %2346 }
 0x323   :  { %v388_v43 = vmul.f32 1.442695, %v385_v41  ;;  %v390_v44 = vsel %vm164_vm9, %v2660_v42, 0.0 }
 0x324   :  { %391 = vadd.xlane.f32.xlu0 %v390_v44  ;;  %452 = vrot.lane.b32.xlu2 %v2589_v59, %s2522_s26 }
 0x325   :  { %2348 = vpow2.f32 %v388_v43 }
 0x328   :  { %v551_v45 = vpop.xlane.xlu1 %550 }
 0x329   :  { %v555_v3 = vsub.f32 %v2639_v23, %v551_v45 }
 0x32a   :  { %v725_v54 = vpop.xlane.xlu0 %724 }
 0x32b   :  { %v2666_v46 = vpop.eup %2348  ;;  %v727_v61 = vsub.f32 %v717_v25, %v725_v54  ;;  %v557_v5 = vmul.f32 1.442695, %v555_v3 }
 0x32c   :  { %794 = vrot.lane.b32.xlu2 %v2589_v59, %s2525_s29  ;;  %v393_v47 = vsel %vm164_vm9, %v2666_v46, 0.0 }
 0x32d   :  { %394 = vadd.xlane.f32.xlu0 %v393_v47  ;;  %v730_v63 = vmul.f32 1.442695, %v727_v61 }
 0x330   :  { %v554_v48 = vpop.xlane.xlu1 %553  ;;  %v722_v49 = vpop.xlane.xlu2 %721 }
 0x331   :  { %v556_v50 = vsub.f32 %v546_v22, %v554_v48  ;;  %v726_v8 = vsub.f32 %v2644_v27, %v722_v49 }
 0x333   :  { %v559_v52 = vmul.f32 1.442695, %v556_v50  ;;  %v728_v10 = vmul.f32 1.442695, %v726_v8 }
 0x335   :  { %2350 = vpow2.f32 %v559_v52 }
 0x336   :  { %2352 = vpow2.f32 %v226_v53 }
 0x337   :  { %2354 = vpow2.f32 %v730_v63 }
 0x338   :  { %v2288_v55 = vpop.permute.xlu2 %2287  ;;  %2356 = vpow2.f32 %v557_v5 }
 0x339   :  { %v2289_v56 = vunpack.i.l.bf16 %v2288_v55  ;;  %v2290_v57 = vunpack.i.h.bf16 %v2288_v55  ;;  %2358 = vpow2.f32 %v728_v10 }
 0x33b   :  { %v2672_v60 = vpop.eup %2350  ;;  %285 = vmatpush.msra.mxu3 %v2289_v56 }
 0x33c   :  { %v564_v62 = vsel %vm164_vm9, %v2672_v60, 0.0  ;;  %v2676_v1 = vpop.eup %2352 }
 0x33d   :  { %311 = vmatpush.msrb.mxu3 %v2290_v57  ;;  %565 = vadd.xlane.f32.xlu1 %v564_v62  ;;  %v231_v4 = vsel %vm164_vm9, %v2676_v1, 0.0  ;;  %v2683_v6 = vpop.eup %2354  ;;  %v427_v28 = vpop.permute.xlu0 %426 }
 0x33e   :  { %v735_v9 = vsel %vm164_vm9, %v2683_v6, 0.0  ;;  %v2688_v12 = vpop.eup %2356 }
 0x33f   :  { %v2692_v13 = vpop.eup %2358 }
 0x340   :  { %v732_v14 = vsel %vm164_vm9, %v2692_v13, 0.0 }
 0x341   :  { %768 = vrot.lane.b32.xlu0 %v2584_v58, %s2525_s29  ;;  %v561_v58 = vsel %vm164_vm9, %v2688_v12, 0.0 }
 0x345   :  { %232 = vadd.xlane.f32.xlu1 %v231_v4 }
 0x34d   :  { %736 = vadd.xlane.f32.xlu1 %v735_v9 }
 0x355   :  { %562 = vadd.xlane.f32.xlu1 %v561_v58 }
 0x35d   :  { %733 = vadd.xlane.f32.xlu1 %v732_v14 }
 0x376   :  { %623 = vrot.lane.b32.xlu1 %v2589_v59, %s2524_s28 }
 0x377   :  { %v230_v15 = vpop.xlane.xlu2 %229 }
 0x378   :  { %2360 = vrcp.f32 %v230_v15  ;;  %v245_v20 = vand.u32 2147483648, %v230_v15  ;;  %v243_v22 = vand.u32 2147483647, %v230_v15  ;;  %vm239_vm11 = vweird.f32 %v230_v15 }
 0x37a   :  { %v246_v24 = vor.u32 1.1754944e-38, %v245_v20  ;;  %vm244_vm13 = vcmp.eq.f32.partialorder %v243_v22, 8.507059e+37 }
 0x37e   :  { %v2361_v16 = vpop.eup %2360 }
 0x37f   :  { %v235_v17 = vmul.f32 %v2361_v16, %v230_v15  ;;  %v2698_v18 = vpop.permute.xlu2 %597  ;;  %vm240_vm10 = vweird.f32 %v2361_v16 }
 0x380   :  { %vm241_vm12 = vmor %vm239_vm11, %vm240_vm10 }
 0x381   :  { %v236_v19 = vsub.f32 1.0, %v235_v17 }
 0x383   :  { %v237_v21 = vmul.f32 %v2361_v16, %v236_v19 }
 0x385   :  { %v238_v23 = vadd.f32 %v2361_v16, %v237_v21 }
 0x387   :  { %v453_v25 = vpop.permute.xlu2 %452  ;;  %v242_v26 = vsel %vm241_vm12, %v2361_v16, %v238_v23 }
 0x388   :  { %473 = vmatpush.msrb.mxu1 %v453_v25  ;;  %v247_v59 = vsel %vm244_vm13, %v246_v24, %v242_v26 }
 0x389   :  { %v248_v27 = vmul.f32 %v2654_v34, %v247_v59 }
 0x38b   :  { %2204 = vmatmul.msk.f32.vlgmr.msra.gmra.mxu3 %vm164_vm9, %v248_v27 }
 0x38c   :  { %447 = vmatpush.msra.mxu3 %v427_v28 }
 0x397   :  { %v392_v29 = vpop.xlane.xlu0 %391 }
 0x398   :  { %v407_v3 = vand.u32 2147483648, %v392_v29  ;;  %vm401_vm10 = vweird.f32 %v392_v29  ;;  %v405_v5 = vand.u32 2147483647, %v392_v29 }
 0x39a   :  { %v408_v58 = vor.u32 1.1754944e-38, %v407_v3  ;;  %vm406_vm12 = vcmp.eq.f32.partialorder %v405_v5, 8.507059e+37 }
 0x3a0   :  { %v395_v30 = vpop.xlane.xlu0 %394 }
 0x3a1   :  { %2362 = vrcp.f32 %v395_v30  ;;  %v422_v36 = vand.u32 2147483648, %v395_v30  ;;  %v420_v37 = vand.u32 2147483647, %v395_v30  ;;  %vm416_vm15 = vweird.f32 %v395_v30 }
 0x3a2   :  { %2364 = vrcp.f32 %v392_v29 }
 0x3a3   :  { %v423_v39 = vor.u32 1.1754944e-38, %v422_v36  ;;  %vm421_vm2 = vcmp.eq.f32.partialorder %v420_v37, 8.507059e+37 }
 0x3a7   :  { %v2363_v31 = vpop.eup %2362 }
 0x3a8   :  { %v412_v32 = vmul.f32 %v2363_v31, %v395_v30  ;;  %vm417_vm14 = vweird.f32 %v2363_v31  ;;  %v2365_v45 = vpop.eup %2364 }
 0x3a9   :  { %vm418_vm1 = vmor %vm416_vm15, %vm417_vm14  ;;  %v397_v47 = vmul.f32 %v2365_v45, %v392_v29  ;;  %vm402_vm6 = vweird.f32 %v2365_v45 }
 0x3aa   :  { %v413_v33 = vsub.f32 1.0, %v412_v32  ;;  %vm403_vm11 = vmor %vm401_vm10, %vm402_vm6 }
 0x3ab   :  { %v398_v51 = vsub.f32 1.0, %v397_v47 }
 0x3ac   :  { %v414_v35 = vmul.f32 %v2363_v31, %v413_v33 }
 0x3ad   :  { %v399_v55 = vmul.f32 %v2365_v45, %v398_v51 }
 0x3ae   :  { %v415_v38 = vadd.f32 %v2363_v31, %v414_v35 }
 0x3af   :  { %v400_v63 = vadd.f32 %v2365_v45, %v399_v55 }
 0x3b0   :  { %v2702_v40 = vpop.xlane.xlu1 %565  ;;  %v419_v34 = vsel %vm418_vm1, %v2363_v31, %v415_v38 }
 0x3b1   :  { %v424_v41 = vsel %vm421_vm2, %v423_v39, %v419_v34  ;;  %v404_v9 = vsel %vm403_vm11, %v2365_v45, %v400_v63  ;;  %vm587_vm6 = vweird.f32 %v2702_v40 }
 0x3b2   :  { %v425_v43 = vmul.f32 %v2666_v46, %v424_v41  ;;  %v409_v15 = vsel %vm406_vm12, %v408_v58, %v404_v9  ;;  %v593_v41 = vand.u32 2147483648, %v2702_v40  ;;  %v52_v58 = vld [vmem:[#allocation7 + $0x30] sm:$0xff] }
 0x3b3   :  { %v410_v21 = vmul.f32 %v2660_v42, %v409_v15  ;;  %v769_v24 = vpop.permute.xlu0 %768  ;;  %v51_v15 = vld [vmem:[#allocation7 + $0x28] sm:$0xff] }
 0x3b4   :  { %2211 = vmatmul.msk.f32.vlgmr.msrb.gmra.mxu1 %vm164_vm9, %v425_v43  ;;  %v594_v51 = vor.u32 1.1754944e-38, %v593_v41 }
 0x3b8   :  { %v233_v44 = vpop.xlane.xlu1 %232 }
 0x3b9   :  { %2366 = vrcp.f32 %v233_v44  ;;  %v260_v54 = vand.u32 2147483648, %v233_v44  ;;  %v258_v56 = vand.u32 2147483647, %v233_v44  ;;  %vm254_vm4 = vweird.f32 %v233_v44 }
 0x3ba   :  { %2368 = vrcp.f32 %v2702_v40 }
 0x3bb   :  { %v261_v46 = vor.u32 1.1754944e-38, %v260_v54  ;;  %vm259_vm7 = vcmp.eq.f32.partialorder %v258_v56, 8.507059e+37 }
 0x3bf   :  { %v2367_v48 = vpop.eup %2366 }
 0x3c0   :  { %v250_v49 = vmul.f32 %v2367_v48, %v233_v44  ;;  %v2706_v50 = vpop.xlane.xlu1 %736  ;;  %vm255_vm3 = vweird.f32 %v2367_v48  ;;  %v2369_v10 = vpop.eup %2368  ;;  %v591_v44 = vand.u32 2147483647, %v2702_v40 }
 0x3c1   :  { %vm256_vm5 = vmor %vm254_vm4, %vm255_vm3  ;;  %v583_v19 = vmul.f32 %v2369_v10, %v2702_v40  ;;  %vm588_vm3 = vweird.f32 %v2369_v10  ;;  %v764_v54 = vand.u32 2147483648, %v2706_v50  ;;  %v762_v40 = vand.u32 2147483647, %v2706_v50 }
 0x3c2   :  { %v251_v52 = vsub.f32 1.0, %v250_v49  ;;  %vm589_vm10 = vmor %vm587_vm6, %vm588_vm3  ;;  %vm592_vm11 = vcmp.eq.f32.partialorder %v591_v44, 8.507059e+37  ;;  %vm828_vm3 = vcmask 261312  }
 0x3c3   :  { %v584_v25 = vsub.f32 1.0, %v583_v19 }
 0x3c4   :  { %v252_v53 = vmul.f32 %v2367_v48, %v251_v52 }
 0x3c5   :  { %v585_v31 = vmul.f32 %v2369_v10, %v584_v25 }
 0x3c6   :  { %v253_v57 = vadd.f32 %v2367_v48, %v252_v53 }
 0x3c7   :  { %v586_v38 = vadd.f32 %v2369_v10, %v585_v31 }
 0x3c8   :  { %v563_v61 = vpop.xlane.xlu1 %562  ;;  %v257_v62 = vsel %vm256_vm5, %v2367_v48, %v253_v57  ;;  %v795_v57 = vpop.permute.xlu2 %794 }
 0x3c9   :  { %2370 = vrcp.f32 %v563_v61  ;;  %v262_v4 = vsel %vm259_vm7, %v261_v46, %v257_v62  ;;  %v576_v23 = vand.u32 2147483647, %v563_v61  ;;  %vm572_vm14 = vweird.f32 %v563_v61 }
 0x3ca   :  { %v263_v8 = vmul.f32 %v2676_v1, %v262_v4  ;;  %2372 = vrcp.f32 %v2706_v50  ;;  %v578_v1 = vand.u32 2147483648, %v563_v61  ;;  %v590_v47 = vsel %vm589_vm10, %v2369_v10, %v586_v38  ;;  %v53_v10 = vld [vmem:[#allocation7 + $0x38] sm:$0xff] }
 0x3cb   :  { %vm577_vm1 = vcmp.eq.f32.partialorder %v576_v23, 8.507059e+37  ;;  %v595_v52 = vsel %vm592_vm11, %v594_v51, %v590_v47  ;;  %v765_v46 = vor.u32 1.1754944e-38, %v764_v54  ;;  %852 = vmatpush.msrb.mxu2 %v53_v10 }
 0x3cc   :  { %2205 = vmatmul.msk.f32.vlgmr.msrb.gmra.mxu3 %vm164_vm9, %v263_v8  ;;  %v579_v27 = vor.u32 1.1754944e-38, %v578_v1  ;;  %v596_v56 = vmul.f32 %v2672_v60, %v595_v52 }
 0x3cd   :  { %618 = vmatpush.msrb.mxu3 %v2698_v18  ;;  %853 = vmatpush.msrb.mxu2 %v52_v58 }
 0x3cf   :  { %v2371_v14 = vpop.eup %2370  ;;  %854 = vmatpush.msrb.mxu2 %v51_v15 }
 0x3d0   :  { %v568_v16 = vmul.f32 %v2371_v14, %v563_v61  ;;  %v734_v17 = vpop.xlane.xlu1 %733  ;;  %vm573_vm13 = vweird.f32 %v2371_v14  ;;  %v2373_v18 = vpop.eup %2372 }
 0x3d1   :  { %2374 = vrcp.f32 %v734_v17  ;;  %vm574_vm15 = vmor %vm572_vm14, %vm573_vm13  ;;  %v754_v42 = vmul.f32 %v2373_v18, %v2706_v50  ;;  %v749_v35 = vand.u32 2147483648, %v734_v17  ;;  %v747_v37 = vand.u32 2147483647, %v734_v17 }
 0x3d2   :  { %v569_v20 = vsub.f32 1.0, %v568_v16  ;;  %vm743_vm4 = vweird.f32 %v734_v17  ;;  %vm759_vm12 = vweird.f32 %v2373_v18  ;;  %vm758_vm13 = vweird.f32 %v2706_v50  ;;  %v50_v16 = vld [vmem:[#allocation7 + $0x20] sm:$0xff] }
 0x3d3   :  { %v755_v39 = vsub.f32 1.0, %v754_v42  ;;  %v750_v43 = vor.u32 1.1754944e-38, %v749_v35  ;;  %vm748_vm7 = vcmp.eq.f32.partialorder %v747_v37, 8.507059e+37  ;;  %vm760_vm14 = vmor %vm758_vm13, %vm759_vm12  ;;  %855 = vmatpush.msrb.mxu2 %v50_v16 }
 0x3d4   :  { %v570_v22 = vmul.f32 %v2371_v14, %v569_v20  ;;  %2210 = vmatmul.msk.f32.vlgmr.msra.gmra.mxu3 %vm164_vm9, %v410_v21 }
 0x3d5   :  { %789 = vmatpush.msra.mxu3 %v769_v24  ;;  %v756_v48 = vmul.f32 %v2373_v18, %v755_v39 }
 0x3d6   :  { %v571_v26 = vadd.f32 %v2371_v14, %v570_v22 }
 0x3d7   :  { %v2375_v59 = vpop.eup %2374  ;;  %v757_v53 = vadd.f32 %v2373_v18, %v756_v48 }
 0x3d8   :  { %v575_v28 = vsel %vm574_vm15, %v2371_v14, %v571_v26  ;;  %v739_v29 = vmul.f32 %v2375_v59, %v734_v17  ;;  %vm744_vm2 = vweird.f32 %v2375_v59  ;;  %vm763_vm15 = vcmp.eq.f32.partialorder %v762_v40, 8.507059e+37 }
 0x3d9   :  { %v580_v30 = vsel %vm577_vm1, %v579_v27, %v575_v28  ;;  %vm745_vm5 = vmor %vm743_vm4, %vm744_vm2  ;;  %v2291_v14 = vpack.i.bf16 %v52_v58, %v53_v10  ;;  %v2296_v17 = vpack.i.bf16 %v50_v16, %v51_v15  ;;  %vm486_vm1 = vcmask 130112  }
 0x3da   :  { %v740_v32 = vsub.f32 1.0, %v739_v29  ;;  %v581_v33 = vmul.f32 %v2688_v12, %v580_v30  ;;  %vm657_vm2 = vcmask 195712  }
 0x3dc   :  { %v741_v36 = vmul.f32 %v2375_v59, %v740_v32  ;;  %2216 = vmatmul.msk.f32.vlgmr.msrb.gmra.mxu3 %vm164_vm9, %v581_v33 }
 0x3de   :  { %v742_v34 = vadd.f32 %v2375_v59, %v741_v36 }
 0x3e0   :  { %v746_v12 = vsel %vm745_vm5, %v2375_v59, %v742_v34 }
 0x3e1   :  { %v751_v45 = vsel %vm748_vm7, %v750_v43, %v746_v12 }
 0x3e2   :  { %v752_v49 = vmul.f32 %v2692_v13, %v751_v45  ;;  %v761_v13 = vsel %vm760_vm14, %v2373_v18, %v757_v53  ;;  %v2333_v18 = vld [vmem:[#allocation7 + $0x102] ss:$0 sm:$0xff] }
 0x3e3   :  { %v766_v61 = vsel %vm763_vm15, %v765_v46, %v761_v13 }
 0x3e4   :  { %2222 = vmatmul.msk.f32.vlgmr.msra.gmra.mxu3 %vm164_vm9, %v752_v49  ;;  %v767_v62 = vmul.f32 %v2683_v6, %v766_v61 }
 0x3e8   :  { %v624_v55 = vpop.permute.xlu1 %623 }
 0x3e9   :  { %644 = vmatpush.msra.mxu1 %v624_v55 }
 0x3ea   :  { %2217 = vmatmul.msk.f32.vlgmr.msra.gmra.mxu1 %vm164_vm9, %v596_v56 }
 0x3eb   :  { %815 = vmatpush.msrb.mxu1 %v795_v57 }
 0x3f2   :  { %2223 = vmatmul.msk.f32.vlgmr.msrb.gmra.mxu1 %vm164_vm9, %v767_v62 }
 0x40e   :  { %v287_v63 = vpop.f32.mrf.mxu3 }
 0x40f   :  { %316 = vst.msk [vmem:[#allocation3] sm:$0xff] %vm164_vm9, %v287_v63 }
 0x431   :  { %v475_v3 = vpop.f32.mrf.mxu1 }
 0x44f   :  { %v313_v50 = vpop.f32.mrf.mxu3 }
 0x450   :  { %317 = vst.msk [vmem:[#allocation3 + $0x8] sm:$0xff] %vm164_vm9, %v313_v50 }
 0x457   :  { %v449_v60 = vpop.f32.mrf.mxu3 }
 0x458   :  { %480 = vrot.lane.b32.xlu0 %v449_v60, %s2512_s18 }
 0x45f   :  { %v620_v4 = vpop.f32.mrf.mxu3 }
 0x460   :  { %651 = vrot.lane.b32.xlu2 %v620_v4, %s2526_s30 }
 0x467   :  { %v646_v5 = vpop.f32.mrf.mxu1  ;;  %v791_v8 = vpop.f32.mrf.mxu3 }
 0x468   :  { %482 = vrot.lane.b32.xlu2 %v475_v3, %s2512_s18  ;;  %822 = vrot.lane.b32.xlu0 %v791_v8, %s2527_s3 }
 0x46f   :  { %v817_v6 = vpop.f32.mrf.mxu1 }
 0x470   :  { %824 = vrot.lane.b32.xlu1 %v817_v6, %s2527_s3  ;;  %653 = vrot.lane.b32.xlu0 %v646_v5, %s2526_s30 }
 0x4ba   :  { %v652_v9 = vpop.permute.xlu2 %651 }
 0x4c2   :  { %v483_v19 = vpop.permute.xlu2 %482 }
 0x4c3   :  { %488 = vst.msk [vmem:[#allocation3 + $0x8] sm:$0xff] %vm486_vm1, %v483_v19 }
 0x4ca   :  { %v481_v20 = vpop.permute.xlu0 %480 }
 0x4cb   :  { %487 = vst.msk [vmem:[#allocation3] sm:$0xff] %vm486_vm1, %v481_v20 }
 0x4cc   :  { %658 = vst.msk [vmem:[#allocation3] sm:$0xff] %vm657_vm2, %v652_v9 }
 0x4da   :  { %v823_v1 = vpop.permute.xlu0 %822 }
 0x4db   :  { %829 = vst.msk [vmem:[#allocation3] sm:$0xff] %vm828_vm3, %v823_v1 }
 0x4e2   :  { %v825_v21 = vpop.permute.xlu1 %824  ;;  %v654_v22 = vpop.permute.xlu0 %653  ;;  %v831_v23 = vld [vmem:[#allocation3] sm:$0xff] }
 0x4e3   :  { %659 = vst.msk [vmem:[#allocation3 + $0x8] sm:$0xff] %vm657_vm2, %v654_v22  ;;  %2224 = vmatmul.msk.f32.vlgmr.msrb.gmra.mxu2 %vm65_vm0, %v831_v23 }
 0x4e4   :  { %830 = vst.msk [vmem:[#allocation3 + $0x8] sm:$0xff] %vm828_vm3, %v825_v21  ;;  %v61_v21 = vld [vmem:[#allocation7 + $0x78] sm:$0xff] }
 0x4e5   :  { %1074 = vmatpush.msrb.mxu3 %v61_v21 }
 0x4eb   :  { %v832_v24 = vld [vmem:[#allocation3 + $0x8] sm:$0xff] }
 0x4ec   :  { %2225 = vmatmul.msk.f32.gmra.mxu2 %vm65_vm0, %v832_v24 }
 0x566   :  { %v857_v25 = vpop.f32.mrf.mxu2 }
 0x567   :  { %v858_v26 = vadd.f32 %v2333_v18, %v857_v25 }
 0x569   :  { %v2748_v59 = vadd.f32 %v858_v26, %v2557_v0 }
 0x56b   :  { %v865_v27 = vsel %vm65_vm0, %v2748_v59, 0.0 }
 0x56c   :  { %866 = vadd.xlane.f32.xlu2 %v865_v27 }
 0x56f   :  { %v860_v28 = vpop.f32.mrf.mxu2 }
 0x570   :  { %v861_v29 = vadd.f32 %v2333_v18, %v860_v28  ;;  %v59_v28 = vld [vmem:[#allocation7 + $0x68] sm:$0xff] }
 0x572   :  { %v2753_v30 = vadd.f32 %v861_v29, %v2561_v2 }
 0x574   :  { %v868_v31 = vsel %vm65_vm0, %v2753_v30, 0.0 }
 0x575   :  { %869 = vadd.xlane.f32.xlu0 %v868_v31 }
 0x589   :  { %2292 = vrot.lane.b32.xlu0 %v2291_v14, %s2515_s0 }
 0x591   :  { %914 = vrot.lane.b32.xlu0 %v2565_v7, %s2528_s4 }
 0x599   :  { %1056 = vrot.lane.b32.xlu0 %v2333_v18, %s2528_s4 }
 0x5df   :  { %v867_v0 = vpop.xlane.xlu2 %866 }
 0x5e0   :  { %v871_v42 = vmul.f32 %v867_v0, %v2569_v11 }
 0x5e2   :  { %v873_v32 = vsub.f32 %v2748_v59, %v871_v42  ;;  %v58_v42 = vld [vmem:[#allocation7 + $0x60] sm:$0xff] }
 0x5e4   :  { %v875_v33 = vmul.f32 %v873_v32, %v873_v32 }
 0x5e6   :  { %v877_v2 = vsel %vm65_vm0, %v875_v33, 0.0 }
 0x5e7   :  { %878 = vadd.xlane.f32.xlu1 %v877_v2  ;;  %v57_v2 = vld [vmem:[#allocation7 + $0x58] sm:$0xff] }
 0x5e8   :  { %v870_v35 = vpop.xlane.xlu0 %869 }
 0x5e9   :  { %v872_v36 = vmul.f32 %v870_v35, %v2569_v11 }
 0x5eb   :  { %v874_v37 = vsub.f32 %v2753_v30, %v872_v36 }
 0x5ed   :  { %v876_v38 = vmul.f32 %v874_v37, %v874_v37 }
 0x5ef   :  { %v880_v39 = vsel %vm65_vm0, %v876_v38, 0.0  ;;  %v56_v38 = vld [vmem:[#allocation7 + $0x50] sm:$0xff] }
 0x5f0   :  { %881 = vadd.xlane.f32.xlu2 %v880_v39 }
 0x5fb   :  { %v2293_v34 = vpop.permute.xlu0 %2292 }
 0x5fc   :  { %v2294_v41 = vunpack.i.l.bf16 %v2293_v34  ;;  %v2295_v43 = vunpack.i.h.bf16 %v2293_v34 }
 0x5fe   :  { %957 = vmatpush.msrb.mxu0 %v2294_v41 }
 0x600   :  { %909 = vrot.lane.b32.xlu1 %v2565_v7, %s2523_s27  ;;  %958 = vmatpush.msrb.mxu0 %v2295_v43  ;;  %v55_v43 = vld [vmem:[#allocation7 + $0x48] sm:$0xff] }
 0x603   :  { %v915_v60 = vpop.permute.xlu0 %914 }
 0x608   :  { %2297 = vrot.lane.b32.xlu2 %v2296_v17, %s2515_s0  ;;  %936 = vrot.lane.b32.xlu1 %v2333_v18, %s2515_s0  ;;  %v60_v18 = vld [vmem:[#allocation7 + $0x70] sm:$0xff] }
 0x609   :  { %1075 = vmatpush.msrb.mxu3 %v60_v18 }
 0x60b   :  { %1076 = vmatpush.msrb.mxu3 %v59_v28 }
 0x60d   :  { %1077 = vmatpush.msrb.mxu3 %v58_v42 }
 0x60f   :  { %1078 = vmatpush.msrb.mxu3 %v57_v2 }
 0x611   :  { %1079 = vmatpush.msrb.mxu3 %v56_v38 }
 0x613   :  { %1080 = vmatpush.msrb.mxu3 %v55_v43 }
 0x65a   :  { %v879_v44 = vpop.xlane.xlu1 %878 }
 0x65b   :  { %v883_v12 = vmul.f32 %v879_v44, %v2569_v11 }
 0x65d   :  { %v885_v45 = vadd.f32 1e-06, %v883_v12 }
 0x65f   :  { %2376 = vrsqrt.f32 %v885_v45  ;;  %vm893_vm5 = vweird.f32 %v885_v45 }
 0x663   :  { %v882_v47 = vpop.xlane.xlu2 %881 }
 0x664   :  { %v884_v48 = vmul.f32 %v882_v47, %v2569_v11 }
 0x665   :  { %v2377_v49 = vpop.eup %2376 }
 0x666   :  { %v888_v51 = vmul.f32 %v2377_v49, %v885_v45  ;;  %v886_v7 = vadd.f32 1e-06, %v884_v48  ;;  %vm894_vm4 = vweird.f32 %v2377_v49  ;;  %v54_v48 = vld [vmem:[#allocation7 + $0x40] sm:$0xff] }
 0x667   :  { %vm895_vm6 = vmor %vm893_vm5, %vm894_vm4  ;;  %1081 = vmatpush.msrb.mxu3 %v54_v48 }
 0x668   :  { %v889_v52 = vmul.f32 %v2377_v49, %v888_v51  ;;  %2378 = vrsqrt.f32 %v886_v7  ;;  %vm903_vm10 = vweird.f32 %v886_v7 }
 0x66a   :  { %v890_v53 = vmul.f32 0.5, %v889_v52 }
 0x66b   :  { %v2298_v54 = vpop.permute.xlu2 %2297 }
 0x66c   :  { %v891_v40 = vsub.f32 1.5, %v890_v53  ;;  %v2300_v55 = vunpack.i.h.bf16 %v2298_v54  ;;  %v2299_v56 = vunpack.i.l.bf16 %v2298_v54 }
 0x66e   :  { %v2379_v57 = vpop.eup %2378  ;;  %v892_v13 = vmul.f32 %v2377_v49, %v891_v40  ;;  %959 = vmatpush.msrb.mxu0 %v2299_v56 }
 0x66f   :  { %v898_v46 = vmul.f32 %v2379_v57, %v886_v7  ;;  %vm904_vm7 = vweird.f32 %v2379_v57 }
 0x670   :  { %v896_v61 = vsel %vm895_vm6, %v2377_v49, %v892_v13  ;;  %960 = vmatpush.msrb.mxu0 %v2300_v55  ;;  %vm905_vm11 = vmor %vm903_vm10, %vm904_vm7  ;;  %vm1059_vm6 = vcmask 523264  }
 0x671   :  { %v899_v62 = vmul.f32 %v2379_v57, %v898_v46  ;;  %v907_v63 = vmul.f32 %v896_v61, %v873_v32 }
 0x672   :  { %v910_v50 = vpop.permute.xlu1 %909 }
 0x673   :  { %v900_v3 = vmul.f32 0.5, %v899_v62  ;;  %v912_v4 = vmul.f32 %v910_v50, %v907_v63 }
 0x675   :  { %v901_v5 = vsub.f32 1.5, %v900_v3  ;;  %v917_v8 = vadd.f32 %v915_v60, %v912_v4 }
 0x677   :  { %v902_v6 = vmul.f32 %v2379_v57, %v901_v5  ;;  %2226 = vmatmul.msk.f32.vlgmr.msrb.gmra.mxu0 %vm65_vm0, %v917_v8 }
 0x679   :  { %v906_v9 = vsel %vm905_vm11, %v2379_v57, %v902_v6 }
 0x67a   :  { %v908_v10 = vmul.f32 %v906_v9, %v874_v37  ;;  %v937_v15 = vpop.permute.xlu1 %936 }
 0x67c   :  { %v913_v58 = vmul.f32 %v910_v50, %v908_v10 }
 0x67e   :  { %v918_v14 = vadd.f32 %v915_v60, %v913_v58 }
 0x680   :  { %2227 = vmatmul.msk.f32.gmra.mxu0 %vm65_vm0, %v918_v14 }
 0x6f4   :  { %v962_v16 = vpop.f32.mrf.mxu0 }
 0x6f5   :  { %v2775_v17 = vadd.f32 %v962_v16, %v937_v15 }
 0x6f7   :  { %v2778_v19 = vmul.f32 0.70710677, %v2775_v17  ;;  %v968_v2 = vmul.f32 0.5, %v2775_v17 }
 0x6f9   :  { %v972_v20 = vmul.f32 %v2778_v19, %v2778_v19 }
 0x6fb   :  { %v973_v1 = vmin.f32 %v972_v20, 16.0 }
 0x6fd   :  { %v974_v22 = vmul.f32 2.1237322e-06, %v973_v1  ;;  %v985_v23 = vmul.f32 3.8918573e-05, %v973_v1  ;;  %v965_v24 = vpop.f32.mrf.mxu0 }
 0x6fe   :  { %v2782_v25 = vadd.f32 %v965_v24, %v937_v15 }
 0x6ff   :  { %v975_v26 = vadd.f32 0.00028619796, %v974_v22  ;;  %v986_v27 = vadd.f32 0.001143296, %v985_v23 }
 0x700   :  { %v2785_v29 = vmul.f32 0.70710677, %v2782_v25 }
 0x701   :  { %v976_v31 = vmul.f32 %v975_v26, %v973_v1  ;;  %v987_v0 = vmul.f32 %v986_v27, %v973_v1 }
 0x702   :  { %v1012_v32 = vmul.f32 %v2785_v29, %v2785_v29 }
 0x703   :  { %v988_v33 = vadd.f32 0.014752088, %v987_v0  ;;  %v977_v35 = vadd.f32 0.0036580483, %v976_v31 }
 0x704   :  { %v1013_v36 = vmin.f32 %v1012_v32, 16.0 }
 0x705   :  { %v989_v37 = vmul.f32 %v988_v33, %v973_v1  ;;  %v978_v44 = vmul.f32 %v977_v35, %v973_v1 }
 0x706   :  { %v1014_v39 = vmul.f32 2.1237322e-06, %v1013_v36  ;;  %v1025_v34 = vmul.f32 3.8918573e-05, %v1013_v36 }
 0x707   :  { %v990_v41 = vadd.f32 0.112945676, %v989_v37  ;;  %v979_v52 = vadd.f32 0.05243302, %v978_v44  ;;  %v969_v44 = vmul.f32 0.5, %v2782_v25 }
 0x708   :  { %v1015_v12 = vadd.f32 0.00028619796, %v1014_v39  ;;  %v1026_v45 = vadd.f32 0.001143296, %v1025_v34 }
 0x709   :  { %v991_v47 = vmul.f32 %v990_v41, %v973_v1  ;;  %v980_v57 = vmul.f32 %v979_v52, %v973_v1 }
 0x70a   :  { %v1016_v49 = vmul.f32 %v1015_v12, %v1013_v36  ;;  %v1027_v51 = vmul.f32 %v1026_v45, %v1013_v36  ;;  %v1057_v45 = vpop.permute.xlu0 %1056 }
 0x70b   :  { %v992_v7 = vadd.f32 0.4994258, %v991_v47  ;;  %v981_v62 = vadd.f32 0.18741608, %v980_v57 }
 0x70c   :  { %v1028_v53 = vadd.f32 0.014752088, %v1027_v51  ;;  %v1017_v40 = vadd.f32 0.0036580483, %v1016_v49 }
 0x70d   :  { %v993_v54 = vmul.f32 %v992_v7, %v973_v1  ;;  %v982_v4 = vmul.f32 %v981_v62, %v973_v1  ;;  %v1094_v62 = vld [vmem:[#allocation7 + $0x98] sm:$0xff] }
 0x70e   :  { %v1029_v55 = vmul.f32 %v1028_v53, %v1013_v36  ;;  %v1018_v46 = vmul.f32 %v1017_v40, %v1013_v36  ;;  %v2805_v53 = vld [vmem:[#allocation7 + $0x103] ss:$0 sm:$0xff]  ;;  %1182 = vmatpush.msra.mxu1 %v1094_v62 }
 0x70f   :  { %v994_v56 = vadd.f32 1.0, %v993_v54  ;;  %v983_v58 = vadd.f32 1.1283791, %v982_v4 }
 0x710   :  { %v1030_v13 = vadd.f32 0.112945676, %v1029_v55  ;;  %v1019_v50 = vadd.f32 0.05243302, %v1018_v46 }
 0x711   :  { %2380 = vrcp.f32 %v994_v56  ;;  %v1006_v10 = vand.u32 2147483648, %v994_v56  ;;  %v1004_v15 = vand.u32 2147483647, %v994_v56  ;;  %vm1000_vm13 = vweird.f32 %v994_v56 }
 0x712   :  { %v1031_v61 = vmul.f32 %v1030_v13, %v1013_v36  ;;  %v1020_v6 = vmul.f32 %v1019_v50, %v1013_v36  ;;  %v984_v23 = vmul.f32 %v983_v58, %v2778_v19  ;;  %v1092_v50 = vld [vmem:[#allocation7 + $0x88] sm:$0xff] }
 0x713   :  { %v1007_v21 = vor.u32 1.1754944e-38, %v1006_v10  ;;  %vm1005_vm15 = vcmp.eq.f32.partialorder %v1004_v15, 8.507059e+37 }
 0x714   :  { %v1032_v63 = vadd.f32 0.4994258, %v1031_v61  ;;  %v1021_v16 = vadd.f32 0.18741608, %v1020_v6 }
 0x716   :  { %v1033_v60 = vmul.f32 %v1032_v63, %v1013_v36  ;;  %v1022_v18 = vmul.f32 %v1021_v16, %v1013_v36  ;;  %v1093_v63 = vld [vmem:[#allocation7 + $0x90] sm:$0xff] }
 0x717   :  { %v2381_v3 = vpop.eup %2380  ;;  %1183 = vmatpush.msra.mxu1 %v1093_v63 }
 0x718   :  { %v996_v5 = vmul.f32 %v2381_v3, %v994_v56  ;;  %v1034_v8 = vadd.f32 1.0, %v1033_v60  ;;  %vm1001_vm12 = vweird.f32 %v2381_v3  ;;  %v1023_v42 = vadd.f32 1.1283791, %v1022_v18  ;;  %v1091_v60 = vld [vmem:[#allocation7 + $0x80] sm:$0xff] }
 0x719   :  { %vm1002_vm14 = vmor %vm1000_vm13, %vm1001_vm12  ;;  %1184 = vmatpush.msra.mxu1 %v1092_v50 }
 0x71a   :  { %v997_v9 = vsub.f32 1.0, %v996_v5  ;;  %2382 = vrcp.f32 %v1034_v8  ;;  %v1046_v0 = vand.u32 2147483648, %v1034_v8  ;;  %v1044_v33 = vand.u32 2147483647, %v1034_v8 }
 0x71b   :  { %vm1040_vm5 = vweird.f32 %v1034_v8  ;;  %v1024_v36 = vmul.f32 %v1023_v42, %v2785_v29  ;;  %1185 = vmatpush.msra.mxu1 %v1091_v60 }
 0x71c   :  { %v998_v14 = vmul.f32 %v2381_v3, %v997_v9  ;;  %v1047_v38 = vor.u32 1.1754944e-38, %v1046_v0  ;;  %vm1045_vm10 = vcmp.eq.f32.partialorder %v1044_v33, 8.507059e+37 }
 0x71e   :  { %v999_v20 = vadd.f32 %v2381_v3, %v998_v14 }
 0x720   :  { %v2383_v22 = vpop.eup %2382  ;;  %v1003_v24 = vsel %vm1002_vm14, %v2381_v3, %v999_v20 }
 0x721   :  { %v1008_v1 = vsel %vm1005_vm15, %v1007_v21, %v1003_v24  ;;  %v1036_v26 = vmul.f32 %v2383_v22, %v1034_v8  ;;  %vm1041_vm4 = vweird.f32 %v2383_v22 }
 0x722   :  { %v1009_v27 = vmul.f32 %v1008_v1, %v984_v23  ;;  %vm1042_vm7 = vmor %vm1040_vm5, %vm1041_vm4 }
 0x723   :  { %v1037_v28 = vsub.f32 1.0, %v1036_v26 }
 0x724   :  { %v2228_v31 = vclamps-f32 %v1009_v27, 1.0 }
 0x725   :  { %v1038_v32 = vmul.f32 %v2383_v22, %v1037_v28 }
 0x726   :  { %v1052_v35 = vadd.f32 1.0, %v2228_v31 }
 0x727   :  { %v1039_v37 = vadd.f32 %v2383_v22, %v1038_v32 }
 0x728   :  { %v1054_v19 = vmul.f32 %v1052_v35, %v968_v2  ;;  %v2335_v35 = vld [vmem:[#allocation7 + $0x104] ss:$0 sm:$0xff] }
 0x729   :  { %v1043_v39 = vsel %vm1042_vm7, %v2383_v22, %v1039_v37 }
 0x72a   :  { %v1048_v34 = vsel %vm1045_vm10, %v1047_v38, %v1043_v39  ;;  %2230 = vmatmul.msk.f32.vlgmr.msrb.gmra.mxu3 %vm1059_vm6, %v1054_v19 }
 0x72b   :  { %v1049_v41 = vmul.f32 %v1048_v34, %v1024_v36 }
 0x72d   :  { %v2229_v43 = vclamps-f32 %v1049_v41, 1.0 }
 0x72f   :  { %v1053_v12 = vadd.f32 1.0, %v2229_v43 }
 0x731   :  { %v1055_v17 = vmul.f32 %v1053_v12, %v969_v44 }
 0x733   :  { %2231 = vmatmul.msk.f32.gmra.mxu3 %vm1059_vm6, %v1055_v17 }
 0x7ad   :  { %v1083_v47 = vpop.f32.mrf.mxu3 }
 0x7ae   :  { %v1084_v48 = vadd.f32 %v1083_v47, %v1057_v45 }
 0x7b0   :  { %v2796_v49 = vadd.f32 %v1084_v48, %v2748_v59 }
 0x7b2   :  { %v1110_v29 = vsel %vm65_vm0, %v2796_v49, 0.0 }
 0x7b3   :  { %1111 = vadd.xlane.f32.xlu2 %v1110_v29 }
 0x7b6   :  { %v1086_v51 = vpop.f32.mrf.mxu3 }
 0x7b7   :  { %v1087_v7 = vadd.f32 %v1086_v51, %v1057_v45 }
 0x7b9   :  { %v2801_v52 = vadd.f32 %v1087_v7, %v2753_v30 }
 0x7bb   :  { %v1113_v25 = vsel %vm65_vm0, %v2801_v52, 0.0 }
 0x7bc   :  { %1114 = vadd.xlane.f32.xlu1 %v1113_v25 }
 0x7d5   :  { %1158 = vrot.lane.b32.xlu1 %v2805_v53, %s2515_s0 }
 0x826   :  { %v1112_v59 = vpop.xlane.xlu2 %1111 }
 0x827   :  { %v1116_v54 = vmul.f32 %v1112_v59, %v2569_v11 }
 0x829   :  { %v1118_v40 = vsub.f32 %v2796_v49, %v1116_v54 }
 0x82b   :  { %v1120_v55 = vmul.f32 %v1118_v40, %v1118_v40 }
 0x82d   :  { %v1122_v56 = vsel %vm65_vm0, %v1120_v55, 0.0 }
 0x82e   :  { %1123 = vadd.xlane.f32.xlu0 %v1122_v56 }
 0x82f   :  { %v1115_v30 = vpop.xlane.xlu1 %1114 }
 0x830   :  { %v1117_v57 = vmul.f32 %v1115_v30, %v2569_v11 }
 0x832   :  { %v1119_v13 = vsub.f32 %v2801_v52, %v1117_v57 }
 0x834   :  { %v1121_v46 = vmul.f32 %v1119_v13, %v1119_v13 }
 0x836   :  { %v1125_v61 = vsel %vm65_vm0, %v1121_v46, 0.0 }
 0x837   :  { %1126 = vadd.xlane.f32.xlu2 %v1125_v61 }
 0x847   :  { %v1159_v18 = vpop.permute.xlu1 %1158 }
 0x8a1   :  { %v1124_v3 = vpop.xlane.xlu0 %1123 }
 0x8a2   :  { %v1128_v4 = vmul.f32 %v1124_v3, %v2569_v11 }
 0x8a4   :  { %v1130_v5 = vadd.f32 1e-06, %v1128_v4 }
 0x8a6   :  { %2384 = vrsqrt.f32 %v1130_v5  ;;  %vm1138_vm12 = vweird.f32 %v1130_v5 }
 0x8aa   :  { %v1127_v8 = vpop.xlane.xlu2 %1126 }
 0x8ab   :  { %v1129_v6 = vmul.f32 %v1127_v8, %v2569_v11 }
 0x8ac   :  { %v2385_v9 = vpop.eup %2384 }
 0x8ad   :  { %v1133_v10 = vmul.f32 %v2385_v9, %v1130_v5  ;;  %v1131_v58 = vadd.f32 1e-06, %v1129_v6  ;;  %vm1139_vm11 = vweird.f32 %v2385_v9 }
 0x8ae   :  { %vm1140_vm13 = vmor %vm1138_vm12, %vm1139_vm11 }
 0x8af   :  { %v1134_v14 = vmul.f32 %v2385_v9, %v1133_v10  ;;  %2386 = vrsqrt.f32 %v1131_v58  ;;  %vm1148_vm15 = vweird.f32 %v1131_v58 }
 0x8b1   :  { %v1135_v15 = vmul.f32 0.5, %v1134_v14 }
 0x8b3   :  { %v1136_v16 = vsub.f32 1.5, %v1135_v15 }
 0x8b5   :  { %v2387_v20 = vpop.eup %2386  ;;  %v1137_v21 = vmul.f32 %v2385_v9, %v1136_v16 }
 0x8b6   :  { %v1143_v22 = vmul.f32 %v2387_v20, %v1131_v58  ;;  %vm1149_vm14 = vweird.f32 %v2387_v20 }
 0x8b7   :  { %v1141_v23 = vsel %vm1140_vm13, %v2385_v9, %v1137_v21  ;;  %vm1150_vm4 = vmor %vm1148_vm15, %vm1149_vm14 }
 0x8b8   :  { %v1144_v24 = vmul.f32 %v2387_v20, %v1143_v22  ;;  %v1152_v1 = vmul.f32 %v1141_v23, %v1118_v40 }
 0x8ba   :  { %v1145_v26 = vmul.f32 0.5, %v1144_v24  ;;  %v1155_v27 = vmul.f32 %v2805_v53, %v1152_v1 }
 0x8bc   :  { %v1146_v28 = vsub.f32 1.5, %v1145_v26  ;;  %v1161_v31 = vadd.f32 %v1159_v18, %v1155_v27 }
 0x8be   :  { %v1147_v0 = vmul.f32 %v2387_v20, %v1146_v28  ;;  %2232 = vmatmul.msk.f32.vlgmr.msra.gmra.mxu1 %vm65_vm0, %v1161_v31 }
 0x8c0   :  { %v1151_v42 = vsel %vm1150_vm4, %v2387_v20, %v1147_v0 }
 0x8c1   :  { %v1153_v32 = vmul.f32 %v1151_v42, %v1119_v13 }
 0x8c3   :  { %v1156_v33 = vmul.f32 %v2805_v53, %v1153_v32 }
 0x8c5   :  { %v1162_v2 = vadd.f32 %v1159_v18, %v1156_v33 }
 0x8c7   :  { %2233 = vmatmul.msk.f32.gmra.mxu1 %vm65_vm0, %v1162_v2 }
 0x93b   :  { %v1187_v37 = vpop.f32.mrf.mxu1 }
 0x93c   :  { %v1188_v19 = vadd.f32 %v2335_v35, %v1187_v37 }
 0x93e   :  { %1193 = vst.msk [vmem:[#allocation2] sm:$0xff] %vm156_vm8, %v1188_v19 }
 0x944   :  { %v1190_v38 = vpop.f32.mrf.mxu1 }
 0x945   :  { %v1191_v36 = vadd.f32 %v2335_v35, %v1190_v38  ;;  %v2822_v39 = vld [vmem:[#allocation2] sm:$0xff] }
 0x946   :  { %1198 = vrot.lane.b32.xlu0 %v2822_v39, %s2515_s0 }
 0x947   :  { %1194 = vst.msk [vmem:[#allocation2 + $0x8] sm:$0xff] %vm156_vm8, %v1191_v36 }
 0x94e   :  { %v2827_v34 = vld [vmem:[#allocation2 + $0x8] sm:$0xff] }
 0x94f   :  { %1385 = vrot.lane.b32.xlu1 %v2827_v34, %s2519_s23  ;;  %1387 = vrot.lane.b32.xlu0 %v2827_v34, %s2516_s1  ;;  %v2883_v6 = vpack.i.bf16 %v2827_v34, %v2822_v39 }
 0x950   :  { %1225 = vrot.lane.b32.xlu2 %v2827_v34, %s2515_s0 }
 0x957   :  { %1557 = vrot.lane.b32.xlu1 %v2827_v34, %s2517_s21  ;;  %1356 = vrot.lane.b32.xlu0 %v2822_v39, %s2519_s23 }
 0x958   :  { %1358 = vrot.lane.b32.xlu2 %v2822_v39, %s2516_s1 }
 0x95f   :  { %1526 = vrot.lane.b32.xlu1 %v2822_v39, %s2520_s24  ;;  %1528 = vrot.lane.b32.xlu0 %v2822_v39, %s2517_s21 }
 0x960   :  { %1555 = vrot.lane.b32.xlu2 %v2827_v34, %s2520_s24 }
 0x967   :  { %1698 = vrot.lane.b32.xlu1 %v2822_v39, %s2518_s22  ;;  %1725 = vrot.lane.b32.xlu0 %v2827_v34, %s2521_s25 }
 0x968   :  { %1727 = vrot.lane.b32.xlu2 %v2827_v34, %s2518_s22 }
 0x970   :  { %1696 = vrot.lane.b32.xlu2 %v2822_v39, %s2521_s25 }
 0x9aa   :  { %v1226_v41 = vpop.permute.xlu2 %1225 }
 0x9ab   :  { %2236 = vmatpush.xpose.msk.msra.mxu0 %vm164_vm9, %v1226_v41 }
 0x9ae   :  { %2237 = vmatmul.msk.f32.vlgmr.msra.gmra.mxu0 %vm164_vm9, %v2827_v34 }
 0x9b2   :  { %v1359_v43 = vpop.permute.xlu2 %1358 }
 0x9b3   :  { %2240 = vmatpush.xpose.msk.msrb.mxu0 %vm164_vm9, %v1359_v43 }
 0x9b8   :  { %v1199_v44 = vpop.permute.xlu0 %1198 }
 0x9b9   :  { %2234 = vmatpush.xpose.msk.msra.mxu2 %vm164_vm9, %v1199_v44 }
 0x9ba   :  { %v1556_v12 = vpop.permute.xlu2 %1555 }
 0x9bc   :  { %2235 = vmatmul.msk.f32.vlgmr.msra.gmra.mxu2 %vm164_vm9, %v2822_v39 }
 0x9c1   :  { %v1386_v17 = vpop.permute.xlu1 %1385  ;;  %v1388_v45 = vpop.permute.xlu0 %1387 }
 0x9c2   :  { %2242 = vmatpush.xpose.msk.msra.mxu3 %vm164_vm9, %v1388_v45  ;;  %v1728_v29 = vpop.permute.xlu2 %1727 }
 0x9c5   :  { %2243 = vmatmul.msk.f32.vlgmr.msra.gmra.mxu3 %vm164_vm9, %v1386_v17 }
 0x9c9   :  { %v1558_v47 = vpop.permute.xlu1 %1557  ;;  %v1357_v48 = vpop.permute.xlu0 %1356 }
 0x9ca   :  { %2241 = vmatmul.msk.f32.vlgmr.msrb.gmra.mxu0 %vm164_vm9, %v1357_v48  ;;  %2248 = vmatpush.xpose.msk.msrb.mxu3 %vm164_vm9, %v1558_v47  ;;  %v1697_v54 = vpop.permute.xlu2 %1696 }
 0x9cd   :  { %2249 = vmatmul.msk.f32.vlgmr.msrb.gmra.mxu3 %vm164_vm9, %v1556_v12 }
 0x9ce   :  { %2254 = vmatpush.xpose.msk.msra.mxu3 %vm164_vm9, %v1728_v29 }
 0x9d1   :  { %v1527_v51 = vpop.permute.xlu1 %1526  ;;  %v1529_v7 = vpop.permute.xlu0 %1528 }
 0x9d2   :  { %2246 = vmatpush.xpose.msk.msra.mxu0 %vm164_vm9, %v1529_v7 }
 0x9d5   :  { %2247 = vmatmul.msk.f32.vlgmr.msra.gmra.mxu0 %vm164_vm9, %v1527_v51 }
 0x9d9   :  { %v1699_v25 = vpop.permute.xlu1 %1698  ;;  %v1726_v59 = vpop.permute.xlu0 %1725 }
 0x9da   :  { %2252 = vmatpush.xpose.msk.msrb.mxu0 %vm164_vm9, %v1699_v25  ;;  %2255 = vmatmul.msk.f32.vlgmr.msra.gmra.mxu3 %vm164_vm9, %v1726_v59 }
 0x9dd   :  { %2253 = vmatmul.msk.f32.vlgmr.msrb.gmra.mxu0 %vm164_vm9, %v1697_v54 }
 0xa2b   :  { %v1248_v40 = vpop.f32.mrf.mxu0 }
 0xa2c   :  { %v1254_v55 = vsel %vm164_vm9, %v1248_v40, -inf }
 0xa2d   :  { %1255 = vmax.xlane.f32.xlu1 %v1254_v55 }
 0xa3f   :  { %v1221_v56 = vpop.f32.mrf.mxu2 }
 0xa40   :  { %v1251_v30 = vsel %vm164_vm9, %v1221_v56, -inf }
 0xa41   :  { %1252 = vmax.xlane.f32.xlu0 %v1251_v30 }
 0xa47   :  { %v1381_v57 = vpop.f32.mrf.mxu0 }
 0xa48   :  { %v1410_v13 = vpop.f32.mrf.mxu3  ;;  %v1413_v46 = vsel %vm164_vm9, %v1381_v57, -inf }
 0xa49   :  { %1414 = vmax.xlane.f32.xlu2 %v1413_v46  ;;  %v1416_v61 = vsel %vm164_vm9, %v1410_v13, -inf }
 0xa4a   :  { %1417 = vmax.xlane.f32.xlu0 %v1416_v61 }
 0xa50   :  { %v1580_v62 = vpop.f32.mrf.mxu3 }
 0xa51   :  { %v1586_v63 = vsel %vm164_vm9, %v1580_v62, -inf }
 0xa52   :  { %v1551_v50 = vpop.f32.mrf.mxu0  ;;  %1587 = vmax.xlane.f32.xlu2 %v1586_v63 }
 0xa53   :  { %v1583_v60 = vsel %vm164_vm9, %v1551_v50, -inf }
 0xa54   :  { %1584 = vmax.xlane.f32.xlu1 %v1583_v60 }
 0xa5a   :  { %v1721_v3 = vpop.f32.mrf.mxu0 }
 0xa5b   :  { %v1753_v4 = vsel %vm164_vm9, %v1721_v3, -inf }
 0xa5c   :  { %1754 = vmax.xlane.f32.xlu0 %v1753_v4 }
 0xa5d   :  { %v1750_v5 = vpop.f32.mrf.mxu3 }
 0xa5e   :  { %v1756_v8 = vsel %vm164_vm9, %v1750_v5, -inf }
 0xa5f   :  { %1757 = vmax.xlane.f32.xlu1 %v1756_v8 }
 0xa6a   :  { %2302 = vrot.lane.b32.xlu2 %v2883_v6, %s2523_s27 }
 0xaa0   :  { %v1256_v9 = vpop.xlane.xlu1 %1255 }
 0xaa1   :  { %v1258_v10 = vsub.f32 %v1248_v40, %v1256_v9 }
 0xaa3   :  { %v1261_v58 = vmul.f32 1.442695, %v1258_v10 }
 0xaa5   :  { %2388 = vpow2.f32 %v1261_v58 }
 0xaab   :  { %v2887_v14 = vpop.eup %2388 }
 0xaac   :  { %v1266_v15 = vsel %vm164_vm9, %v2887_v14, 0.0 }
 0xaad   :  { %1267 = vadd.xlane.f32.xlu0 %v1266_v15 }
 0xab4   :  { %v1253_v16 = vpop.xlane.xlu0 %1252 }
 0xab5   :  { %v1257_v20 = vsub.f32 %v1221_v56, %v1253_v16 }
 0xab7   :  { %v1259_v21 = vmul.f32 1.442695, %v1257_v20 }
 0xab9   :  { %2390 = vpow2.f32 %v1259_v21 }
 0xabc   :  { %v1415_v22 = vpop.xlane.xlu2 %1414 }
 0xabd   :  { %v1419_v23 = vsub.f32 %v1381_v57, %v1415_v22  ;;  %v1418_v24 = vpop.xlane.xlu0 %1417 }
 0xabe   :  { %v1420_v1 = vsub.f32 %v1410_v13, %v1418_v24 }
 0xabf   :  { %v2891_v18 = vpop.eup %2390  ;;  %v1421_v26 = vmul.f32 1.442695, %v1419_v23 }
 0xac0   :  { %v1423_v27 = vmul.f32 1.442695, %v1420_v1  ;;  %v1263_v28 = vsel %vm164_vm9, %v2891_v18, 0.0 }
 0xac1   :  { %2392 = vpow2.f32 %v1421_v26  ;;  %1264 = vadd.xlane.f32.xlu2 %v1263_v28 }
 0xac2   :  { %2394 = vpow2.f32 %v1423_v27 }
 0xac5   :  { %v1588_v31 = vpop.xlane.xlu2 %1587 }
 0xac6   :  { %v1590_v0 = vsub.f32 %v1580_v62, %v1588_v31 }
 0xac7   :  { %v2895_v42 = vpop.eup %2392  ;;  %v1585_v32 = vpop.xlane.xlu1 %1584 }
 0xac8   :  { %v2897_v33 = vpop.eup %2394  ;;  %v1593_v2 = vmul.f32 1.442695, %v1590_v0  ;;  %v1589_v35 = vsub.f32 %v1551_v50, %v1585_v32  ;;  %v1425_v37 = vsel %vm164_vm9, %v2895_v42, 0.0 }
 0xac9   :  { %1426 = vadd.xlane.f32.xlu1 %v1425_v37  ;;  %v1428_v19 = vsel %vm164_vm9, %v2897_v33, 0.0 }
 0xaca   :  { %2396 = vpow2.f32 %v1593_v2  ;;  %v1591_v38 = vmul.f32 1.442695, %v1589_v35  ;;  %1429 = vadd.xlane.f32.xlu2 %v1428_v19 }
 0xacc   :  { %2398 = vpow2.f32 %v1591_v38 }
 0xacd   :  { %v2303_v36 = vpop.permute.xlu2 %2302 }
 0xace   :  { %v2305_v39 = vunpack.i.h.bf16 %v2303_v36  ;;  %v2304_v34 = vunpack.i.l.bf16 %v2303_v36 }
 0xacf   :  { %v1755_v41 = vpop.xlane.xlu0 %1754 }
 0xad0   :  { %v2903_v43 = vpop.eup %2396  ;;  %v1759_v44 = vsub.f32 %v1721_v3, %v1755_v41  ;;  %1320 = vmatpush.msrb.mxu1 %v2304_v34  ;;  %1346 = vmatpush.msrb.mxu2 %v2305_v39 }
 0xad1   :  { %v1598_v12 = vsel %vm164_vm9, %v2903_v43, 0.0 }
 0xad2   :  { %v2907_v17 = vpop.eup %2398  ;;  %v1761_v45 = vmul.f32 1.442695, %v1759_v44  ;;  %v1758_v47 = vpop.xlane.xlu1 %1757  ;;  %1599 = vadd.xlane.f32.xlu1 %v1598_v12 }
 0xad3   :  { %v1760_v48 = vsub.f32 %v1750_v5, %v1758_v47  ;;  %v1595_v29 = vsel %vm164_vm9, %v2907_v17, 0.0 }
 0xad4   :  { %2400 = vpow2.f32 %v1761_v45  ;;  %1596 = vadd.xlane.f32.xlu0 %v1595_v29 }
 0xad5   :  { %v1763_v51 = vmul.f32 1.442695, %v1760_v48 }
 0xad7   :  { %2402 = vpow2.f32 %v1763_v51 }
 0xada   :  { %v2911_v7 = vpop.eup %2400 }
 0xadb   :  { %v1765_v25 = vsel %vm164_vm9, %v2911_v7, 0.0 }
 0xadc   :  { %1766 = vadd.xlane.f32.xlu0 %v1765_v25 }
 0xadd   :  { %v2915_v59 = vpop.eup %2402 }
 0xade   :  { %v1768_v54 = vsel %vm164_vm9, %v2915_v59, 0.0 }
 0xadf   :  { %1769 = vadd.xlane.f32.xlu1 %v1768_v54 }
 0xae2   :  { %2317 = vrot.lane.b32.xlu2 %v2883_v6, %s2525_s29 }
 0xaf0   :  { %2307 = vrot.lane.b32.xlu0 %v2883_v6, %s2522_s26 }
 0xaf8   :  { %2312 = vrot.lane.b32.xlu1 %v2883_v6, %s2524_s28 }
 0xb20   :  { %v1268_v40 = vpop.xlane.xlu0 %1267 }
 0xb21   :  { %2404 = vrcp.f32 %v1268_v40  ;;  %v1295_v57 = vand.u32 2147483648, %v1268_v40  ;;  %v1293_v46 = vand.u32 2147483647, %v1268_v40  ;;  %vm1289_vm5 = vweird.f32 %v1268_v40 }
 0xb23   :  { %v1296_v62 = vor.u32 1.1754944e-38, %v1295_v57  ;;  %vm1294_vm10 = vcmp.eq.f32.partialorder %v1293_v46, 8.507059e+37 }
 0xb27   :  { %v2405_v55 = vpop.eup %2404 }
 0xb28   :  { %v1285_v56 = vmul.f32 %v2405_v55, %v1268_v40  ;;  %vm1290_vm8 = vweird.f32 %v2405_v55 }
 0xb29   :  { %vm1291_vm7 = vmor %vm1289_vm5, %vm1290_vm8 }
 0xb2a   :  { %v1286_v30 = vsub.f32 1.0, %v1285_v56 }
 0xb2c   :  { %v1287_v13 = vmul.f32 %v2405_v55, %v1286_v30 }
 0xb2e   :  { %v1288_v61 = vadd.f32 %v2405_v55, %v1287_v13 }
 0xb30   :  { %v1292_v63 = vsel %vm1291_vm7, %v2405_v55, %v1288_v61 }
 0xb31   :  { %v1297_v50 = vsel %vm1294_vm10, %v1296_v62, %v1292_v63 }
 0xb32   :  { %v1298_v60 = vmul.f32 %v2887_v14, %v1297_v50 }
 0xb34   :  { %2239 = vmatmul.msk.f32.vlgmr.msrb.gmra.mxu2 %vm164_vm9, %v1298_v60  ;;  %v1265_v3 = vpop.xlane.xlu2 %1264 }
 0xb35   :  { %2406 = vrcp.f32 %v1265_v3  ;;  %v1280_v10 = vand.u32 2147483648, %v1265_v3  ;;  %vm1274_vm12 = vweird.f32 %v1265_v3  ;;  %v1278_v15 = vand.u32 2147483647, %v1265_v3 }
 0xb37   :  { %v1281_v21 = vor.u32 1.1754944e-38, %v1280_v10  ;;  %vm1279_vm14 = vcmp.eq.f32.partialorder %v1278_v15, 8.507059e+37 }
 0xb3b   :  { %v2407_v4 = vpop.eup %2406 }
 0xb3c   :  { %v1270_v5 = vmul.f32 %v2407_v4, %v1265_v3  ;;  %v1427_v6 = vpop.xlane.xlu1 %1426  ;;  %vm1275_vm11 = vweird.f32 %v2407_v4 }
 0xb3d   :  { %v1430_v16 = vpop.xlane.xlu2 %1429  ;;  %vm1276_vm13 = vmor %vm1274_vm12, %vm1275_vm11  ;;  %2408 = vrcp.f32 %v1427_v6  ;;  %vm1436_vm8 = vweird.f32 %v1427_v6  ;;  %v1442_v47 = vand.u32 2147483648, %v1427_v6  ;;  %v1440_v51 = vand.u32 2147483647, %v1427_v6 }
 0xb3e   :  { %v1271_v8 = vsub.f32 1.0, %v1270_v5  ;;  %2410 = vrcp.f32 %v1430_v16  ;;  %v1457_v48 = vand.u32 2147483648, %v1430_v16  ;;  %vm1451_vm7 = vweird.f32 %v1430_v16 }
 0xb3f   :  { %v1455_v25 = vand.u32 2147483647, %v1430_v16  ;;  %v1443_v13 = vor.u32 1.1754944e-38, %v1442_v47  ;;  %vm1441_vm11 = vcmp.eq.f32.partialorder %v1440_v51, 8.507059e+37 }
 0xb40   :  { %v1272_v9 = vmul.f32 %v2407_v4, %v1271_v8  ;;  %v1458_v46 = vor.u32 1.1754944e-38, %v1457_v48 }
 0xb41   :  { %vm1456_vm12 = vcmp.eq.f32.partialorder %v1455_v25, 8.507059e+37 }
 0xb42   :  { %v1273_v58 = vadd.f32 %v2407_v4, %v1272_v9 }
 0xb43   :  { %v2409_v24 = vpop.eup %2408 }
 0xb44   :  { %v1277_v20 = vsel %vm1276_vm13, %v2407_v4, %v1273_v58  ;;  %v2411_v26 = vpop.eup %2410  ;;  %v1432_v27 = vmul.f32 %v2409_v24, %v1427_v6  ;;  %vm1437_vm15 = vweird.f32 %v2409_v24 }
 0xb45   :  { %v1282_v14 = vsel %vm1279_vm14, %v1281_v21, %v1277_v20  ;;  %v2929_v23 = vpop.xlane.xlu1 %1599  ;;  %v1447_v28 = vmul.f32 %v2411_v26, %v1430_v16  ;;  %vm1452_vm4 = vweird.f32 %v2411_v26  ;;  %vm2953_vm5 = vmor %vm1436_vm8, %vm1437_vm15 }
 0xb46   :  { %v1283_v1 = vmul.f32 %v2891_v18, %v1282_v14  ;;  %2412 = vrcp.f32 %v2929_v23  ;;  %v1433_v31 = vsub.f32 1.0, %v1432_v27  ;;  %vm1453_vm10 = vmor %vm1451_vm7, %vm1452_vm4  ;;  %vm1621_vm13 = vweird.f32 %v2929_v23 }
 0xb47   :  { %v2927_v22 = vpop.xlane.xlu0 %1596  ;;  %v1448_v2 = vsub.f32 1.0, %v1447_v28  ;;  %v1625_v61 = vand.u32 2147483647, %v2929_v23  ;;  %v1627_v8 = vand.u32 2147483648, %v2929_v23 }
 0xb48   :  { %2238 = vmatmul.msk.f32.vlgmr.msrb.gmra.mxu1 %vm164_vm9, %v1283_v1  ;;  %2414 = vrcp.f32 %v2927_v22  ;;  %v1434_v18 = vmul.f32 %v2409_v24, %v1433_v31  ;;  %v1612_v6 = vand.u32 2147483648, %v2927_v22  ;;  %vm1606_vm8 = vweird.f32 %v2927_v22 }
 0xb49   :  { %v1449_v38 = vmul.f32 %v2411_v26, %v1448_v2  ;;  %v1610_v15 = vand.u32 2147483647, %v2927_v22  ;;  %vm1626_vm7 = vcmp.eq.f32.partialorder %v1625_v61, 8.507059e+37  ;;  %v1095_v61 = vld [vmem:[#allocation7 + $0xa0] sm:$0xff] }
 0xb4a   :  { %v1435_v39 = vadd.f32 %v2409_v24, %v1434_v18 }
 0xb4b   :  { %v1450_v44 = vadd.f32 %v2411_v26, %v1449_v38 }
 0xb4c   :  { %v2937_v32 = vpop.eup %2412  ;;  %v1439_v54 = vsel %vm2953_vm5, %v2409_v24, %v1435_v39 }
 0xb4d   :  { %v1617_v19 = vmul.f32 %v2937_v32, %v2929_v23  ;;  %v1454_v55 = vsel %vm1453_vm10, %v2411_v26, %v1450_v44  ;;  %v1444_v62 = vsel %vm1441_vm11, %v1443_v13, %v1439_v54  ;;  %vm1622_vm14 = vweird.f32 %v2937_v32  ;;  %v2318_v26 = vpop.permute.xlu2 %2317 }
 0xb4e   :  { %v2941_v37 = vpop.eup %2414  ;;  %v1459_v63 = vsel %vm1456_vm12, %v1458_v46, %v1454_v55  ;;  %vm2975_vm4 = vmor %vm1621_vm13, %vm1622_vm14  ;;  %v1445_v16 = vmul.f32 %v2895_v42, %v1444_v62  ;;  %v1628_v42 = vor.u32 1.1754944e-38, %v1627_v8  ;;  %vm1611_vm10 = vcmp.eq.f32.partialorder %v1610_v15, 8.507059e+37  ;;  %v1096_v46 = vld [vmem:[#allocation7 + $0xa8] sm:$0xff] }
 0xb4f   :  { %v2935_v0 = vpop.xlane.xlu0 %1766  ;;  %v1602_v36 = vmul.f32 %v2941_v37, %v2927_v22  ;;  %v1618_v34 = vsub.f32 1.0, %v1617_v19  ;;  %vm1607_vm15 = vweird.f32 %v2941_v37  ;;  %v1460_v20 = vmul.f32 %v2897_v33, %v1459_v63 }
 0xb50   :  { %2416 = vrcp.f32 %v2935_v0  ;;  %vm1608_vm5 = vmor %vm1606_vm8, %vm1607_vm15  ;;  %v1613_v22 = vor.u32 1.1754944e-38, %v1612_v6  ;;  %vm1776_vm11 = vweird.f32 %v2935_v0  ;;  %v1780_v28 = vand.u32 2147483647, %v2935_v0  ;;  %v2336_v6 = vld [vmem:[#allocation7 + $0x105] ss:$0 sm:$0xff] }
 0xb51   :  { %v1603_v12 = vsub.f32 1.0, %v1602_v36  ;;  %v1619_v40 = vmul.f32 %v2937_v32, %v1618_v34  ;;  %v1782_v2 = vand.u32 2147483648, %v2935_v0  ;;  %v2320_v44 = vunpack.i.h.bf16 %v2318_v26 }
 0xb52   :  { %v2939_v35 = vpop.xlane.xlu1 %1769  ;;  %vm1781_vm8 = vcmp.eq.f32.partialorder %v1780_v28, 8.507059e+37  ;;  %v2326_v62 = vpack.i.bf16 %v1095_v61, %v1096_v46 }
 0xb53   :  { %2418 = vrcp.f32 %v2939_v35  ;;  %v1604_v56 = vmul.f32 %v2941_v37, %v1603_v12  ;;  %v1620_v50 = vadd.f32 %v2937_v32, %v1619_v40  ;;  %vm1791_vm15 = vweird.f32 %v2939_v35 }
 0xb54   :  { %v1795_v36 = vand.u32 2147483647, %v2939_v35  ;;  %v2319_v12 = vunpack.i.l.bf16 %v2318_v26 }
 0xb55   :  { %v1605_v60 = vadd.f32 %v2941_v37, %v1604_v56  ;;  %v1624_v21 = vsel %vm2975_vm4, %v2937_v32, %v1620_v50 }
 0xb56   :  { %v2949_v41 = vpop.eup %2416  ;;  %v1629_v33 = vsel %vm1626_vm7, %v1628_v42, %v1624_v21 }
 0xb57   :  { %v1772_v30 = vmul.f32 %v2949_v41, %v2935_v0  ;;  %v1609_v14 = vsel %vm1608_vm5, %v2941_v37, %v1605_v60  ;;  %vm1777_vm12 = vweird.f32 %v2949_v41  ;;  %v1797_v37 = vand.u32 2147483648, %v2939_v35 }
 0xb58   :  { %v1614_v1 = vsel %vm1611_vm10, %v1613_v22, %v1609_v14  ;;  %vm2999_vm14 = vmor %vm1776_vm11, %vm1777_vm12  ;;  %v1630_v34 = vmul.f32 %v2903_v43, %v1629_v33  ;;  %vm1796_vm5 = vcmp.eq.f32.partialorder %v1795_v36, 8.507059e+37 }
 0xb59   :  { %v2951_v45 = vpop.eup %2418  ;;  %v1773_v3 = vsub.f32 1.0, %v1772_v30  ;;  %v1615_v39 = vmul.f32 %v2907_v17, %v1614_v1  ;;  %v1798_v48 = vor.u32 1.1754944e-38, %v1797_v37  ;;  %v1098_v30 = vld [vmem:[#allocation7 + $0xb8] sm:$0xff] }
 0xb5a   :  { %v1787_v57 = vmul.f32 %v2951_v45, %v2939_v35  ;;  %vm1792_vm13 = vweird.f32 %v2951_v45  ;;  %v1783_v35 = vor.u32 1.1754944e-38, %v1782_v2  ;;  %1884 = vmatpush.msra.mxu0 %v1098_v30 }
 0xb5b   :  { %v1774_v23 = vmul.f32 %v2949_v41, %v1773_v3  ;;  %vm1793_vm4 = vmor %vm1791_vm15, %vm1792_vm13 }
 0xb5c   :  { %v1788_v4 = vsub.f32 1.0, %v1787_v57  ;;  %v1097_v57 = vld [vmem:[#allocation7 + $0xb0] sm:$0xff] }
 0xb5d   :  { %v1775_v27 = vadd.f32 %v2949_v41, %v1774_v23  ;;  %v2321_v13 = vpack.i.bf16 %v1097_v57, %v1098_v30  ;;  %1885 = vmatpush.msra.mxu0 %v1097_v57 }
 0xb5e   :  { %v1789_v24 = vmul.f32 %v2951_v45, %v1788_v4 }
 0xb5f   :  { %v1779_v0 = vsel %vm2999_vm14, %v2949_v41, %v1775_v27  ;;  %1886 = vmatpush.msra.mxu0 %v1096_v46 }
 0xb60   :  { %v1790_v31 = vadd.f32 %v2951_v45, %v1789_v24  ;;  %v1784_v43 = vsel %vm1781_vm8, %v1783_v35, %v1779_v0 }
 0xb61   :  { %v1785_v29 = vmul.f32 %v2911_v7, %v1784_v43  ;;  %1887 = vmatpush.msra.mxu0 %v1095_v61 }
 0xb62   :  { %v2308_v5 = vpop.permute.xlu0 %2307  ;;  %v1794_v47 = vsel %vm1793_vm4, %v2951_v45, %v1790_v31 }
 0xb63   :  { %v2310_v9 = vunpack.i.h.bf16 %v2308_v5  ;;  %v2309_v10 = vunpack.i.l.bf16 %v2308_v5  ;;  %v1799_v17 = vsel %vm1796_vm5, %v1798_v48, %v1794_v47 }
 0xb64   :  { %v1800_v51 = vmul.f32 %v2915_v59, %v1799_v17 }
 0xb65   :  { %1482 = vmatpush.msra.mxu1 %v2309_v10  ;;  %1508 = vmatpush.msra.mxu2 %v2310_v9 }
 0xb66   :  { %2244 = vmatmul.msk.f32.vlgmr.msra.gmra.mxu1 %vm164_vm9, %v1445_v16  ;;  %2245 = vmatmul.msk.f32.vlgmr.msra.gmra.mxu2 %vm164_vm9, %v1460_v20 }
 0xb6a   :  { %v2313_v32 = vpop.permute.xlu1 %2312 }
 0xb6b   :  { %v2315_v18 = vunpack.i.h.bf16 %v2313_v32  ;;  %v2314_v19 = vunpack.i.l.bf16 %v2313_v32 }
 0xb6d   :  { %1652 = vmatpush.msrb.mxu1 %v2314_v19  ;;  %1678 = vmatpush.msrb.mxu2 %v2315_v18 }
 0xb6e   :  { %2250 = vmatmul.msk.f32.vlgmr.msrb.gmra.mxu1 %vm164_vm9, %v1615_v39  ;;  %2251 = vmatmul.msk.f32.vlgmr.msrb.gmra.mxu2 %vm164_vm9, %v1630_v34 }
 0xb6f   :  { %1822 = vmatpush.msra.mxu1 %v2319_v12  ;;  %1848 = vmatpush.msra.mxu2 %v2320_v44 }
 0xb76   :  { %2256 = vmatmul.msk.f32.vlgmr.msra.gmra.mxu1 %vm164_vm9, %v1785_v29  ;;  %2257 = vmatmul.msk.f32.vlgmr.msra.gmra.mxu2 %vm164_vm9, %v1800_v51 }
 0xbb7   :  { %v1348_v41 = vpop.f32.mrf.mxu2 }
 0xbb8   :  { %1352 = vst.msk [vmem:[#allocation3 + $0x8] sm:$0xff] %vm164_vm9, %v1348_v41 }
 0xbc5   :  { %v1322_v45 = vpop.f32.mrf.mxu1 }
 0xbc6   :  { %1351 = vst.msk [vmem:[#allocation3] sm:$0xff] %vm164_vm9, %v1322_v45 }
 0xbe3   :  { %v1484_v25 = vpop.f32.mrf.mxu1 }
 0xbe4   :  { %1515 = vrot.lane.b32.xlu0 %v1484_v25, %s2512_s18 }
 0xbe9   :  { %v1510_v54 = vpop.f32.mrf.mxu2 }
 0xbeb   :  { %v1654_v40 = vpop.f32.mrf.mxu1 }
 0xbec   :  { %1685 = vrot.lane.b32.xlu2 %v1654_v40, %s2526_s30 }
 0xbf1   :  { %v1680_v7 = vpop.f32.mrf.mxu2 }
 0xbf2   :  { %1687 = vrot.lane.b32.xlu1 %v1680_v7, %s2526_s30 }
 0xbf3   :  { %v1824_v59 = vpop.f32.mrf.mxu1 }
 0xbf4   :  { %1517 = vrot.lane.b32.xlu2 %v1510_v54, %s2512_s18  ;;  %1855 = vrot.lane.b32.xlu0 %v1824_v59, %s2527_s3 }
 0xbf9   :  { %v1850_v55 = vpop.f32.mrf.mxu2 }
 0xbfc   :  { %1857 = vrot.lane.b32.xlu0 %v1850_v55, %s2527_s3 }
 0xc46   :  { %v1686_v56 = vpop.permute.xlu2 %1685 }
 0xc4e   :  { %v1518_v63 = vpop.permute.xlu2 %1517 }
 0xc4f   :  { %1522 = vst.msk [vmem:[#allocation3 + $0x8] sm:$0xff] %vm486_vm1, %v1518_v63 }
 0xc56   :  { %v1516_v50 = vpop.permute.xlu0 %1515 }
 0xc57   :  { %1521 = vst.msk [vmem:[#allocation3] sm:$0xff] %vm486_vm1, %v1516_v50 }
 0xc58   :  { %1691 = vst.msk [vmem:[#allocation3] sm:$0xff] %vm657_vm2, %v1686_v56 }
 0xc64   :  { %v1688_v60 = vpop.permute.xlu1 %1687 }
 0xc65   :  { %1692 = vst.msk [vmem:[#allocation3 + $0x8] sm:$0xff] %vm657_vm2, %v1688_v60 }
 0xc66   :  { %v1856_v3 = vpop.permute.xlu0 %1855 }
 0xc67   :  { %1861 = vst.msk [vmem:[#allocation3] sm:$0xff] %vm828_vm3, %v1856_v3 }
 0xc6e   :  { %v1858_v4 = vpop.permute.xlu0 %1857  ;;  %v1863_v5 = vld [vmem:[#allocation3] sm:$0xff] }
 0xc6f   :  { %1862 = vst.msk [vmem:[#allocation3 + $0x8] sm:$0xff] %vm828_vm3, %v1858_v4  ;;  %2258 = vmatmul.msk.f32.vlgmr.msra.gmra.mxu0 %vm65_vm0, %v1863_v5 }
 0xc76   :  { %v1864_v8 = vld [vmem:[#allocation3 + $0x8] sm:$0xff] }
 0xc77   :  { %2259 = vmatmul.msk.f32.gmra.mxu0 %vm65_vm0, %v1864_v8 }
 0xcec   :  { %v1889_v9 = vpop.f32.mrf.mxu0 }
 0xced   :  { %v1890_v10 = vadd.f32 %v2336_v6, %v1889_v9 }
 0xcef   :  { %v3034_v58 = vadd.f32 %v1890_v10, %v2796_v49 }
 0xcf1   :  { %v1897_v15 = vsel %vm65_vm0, %v3034_v58, 0.0 }
 0xcf2   :  { %1898 = vadd.xlane.f32.xlu2 %v1897_v15  ;;  %v1105_v15 = vld [vmem:[#allocation7 + $0xf0] sm:$0xff] }
 0xcf4   :  { %v1892_v16 = vpop.f32.mrf.mxu0 }
 0xcf5   :  { %v1893_v20 = vadd.f32 %v2336_v6, %v1892_v16 }
 0xcf7   :  { %v3039_v21 = vadd.f32 %v1893_v20, %v2801_v52 }
 0xcf9   :  { %v1900_v14 = vsel %vm65_vm0, %v3039_v21, 0.0 }
 0xcfa   :  { %1901 = vadd.xlane.f32.xlu1 %v1900_v14 }
 0xd13   :  { %2322 = vrot.lane.b32.xlu1 %v2321_v13, %s2515_s0 }
 0xd1b   :  { %1946 = vrot.lane.b32.xlu1 %v2805_v53, %s2528_s4 }
 0xd65   :  { %v1899_v49 = vpop.xlane.xlu2 %1898 }
 0xd66   :  { %v1903_v23 = vmul.f32 %v1899_v49, %v2569_v11  ;;  %v1104_v49 = vld [vmem:[#allocation7 + $0xe8] sm:$0xff] }
 0xd68   :  { %v1905_v24 = vsub.f32 %v3034_v58, %v1903_v23 }
 0xd6a   :  { %v1907_v42 = vmul.f32 %v1905_v24, %v1905_v24 }
 0xd6c   :  { %v1909_v22 = vsel %vm65_vm0, %v1907_v42, 0.0  ;;  %v1103_v42 = vld [vmem:[#allocation7 + $0xe0] sm:$0xff] }
 0xd6d   :  { %v1902_v33 = vpop.xlane.xlu1 %1901  ;;  %1910 = vadd.xlane.f32.xlu0 %v1909_v22 }
 0xd6e   :  { %v1904_v52 = vmul.f32 %v1902_v33, %v2569_v11 }
 0xd70   :  { %v1906_v1 = vsub.f32 %v3039_v21, %v1904_v52 }
 0xd72   :  { %v1908_v26 = vmul.f32 %v1906_v1, %v1906_v1 }
 0xd74   :  { %v1912_v27 = vsel %vm65_vm0, %v1908_v26, 0.0 }
 0xd75   :  { %1913 = vadd.xlane.f32.xlu2 %v1912_v27 }
 0xd81   :  { %2327 = vrot.lane.b32.xlu0 %v2326_v62, %s2515_s0 }
 0xd85   :  { %v2323_v28 = vpop.permute.xlu1 %2322 }
 0xd86   :  { %v2324_v31 = vunpack.i.l.bf16 %v2323_v28  ;;  %v2325_v32 = vunpack.i.h.bf16 %v2323_v28 }
 0xd88   :  { %1989 = vmatpush.msrb.mxu3 %v2324_v31  ;;  %v1101_v31 = vld [vmem:[#allocation7 + $0xd0] sm:$0xff] }
 0xd89   :  { %1968 = vrot.lane.b32.xlu0 %v2336_v6, %s2515_s0 }
 0xd8a   :  { %1990 = vmatpush.msrb.mxu3 %v2325_v32 }
 0xd8d   :  { %1941 = vrot.lane.b32.xlu2 %v2805_v53, %s2523_s27  ;;  %v1947_v54 = vpop.permute.xlu1 %1946 }
 0xd95   :  { %2088 = vrot.lane.b32.xlu2 %v2336_v6, %s2528_s4  ;;  %v1106_v6 = vld [vmem:[#allocation7 + $0xf8] sm:$0xff] }
 0xd96   :  { %2105 = vmatpush.msrb.mxu1 %v1106_v6 }
 0xd98   :  { %2106 = vmatpush.msrb.mxu1 %v1105_v15 }
 0xd9a   :  { %2107 = vmatpush.msrb.mxu1 %v1104_v49 }
 0xd9c   :  { %2108 = vmatpush.msrb.mxu1 %v1103_v42 }
 0xde0   :  { %v1911_v2 = vpop.xlane.xlu0 %1910 }
 0xde1   :  { %v1915_v37 = vmul.f32 %v1911_v2, %v2569_v11 }
 0xde3   :  { %v1917_v18 = vadd.f32 1e-06, %v1915_v37 }
 0xde5   :  { %2420 = vrsqrt.f32 %v1917_v18  ;;  %vm1925_vm1 = vweird.f32 %v1917_v18 }
 0xde8   :  { %v1914_v19 = vpop.xlane.xlu2 %1913 }
 0xde9   :  { %v1916_v38 = vmul.f32 %v1914_v19, %v2569_v11  ;;  %v1100_v19 = vld [vmem:[#allocation7 + $0xc8] sm:$0xff] }
 0xdeb   :  { %v2421_v36 = vpop.eup %2420  ;;  %v1918_v39 = vadd.f32 1e-06, %v1916_v38 }
 0xdec   :  { %v1920_v34 = vmul.f32 %v2421_v36, %v1917_v18  ;;  %vm1926_vm9 = vweird.f32 %v2421_v36 }
 0xded   :  { %2422 = vrsqrt.f32 %v1918_v39  ;;  %vm1927_vm2 = vmor %vm1925_vm1, %vm1926_vm9  ;;  %vm1935_vm7 = vweird.f32 %v1918_v39 }
 0xdee   :  { %v1921_v53 = vmul.f32 %v2421_v36, %v1920_v34  ;;  %v1099_v34 = vld [vmem:[#allocation7 + $0xc0] sm:$0xff] }
 0xdf0   :  { %v1922_v44 = vmul.f32 0.5, %v1921_v53  ;;  %v1942_v41 = vpop.permute.xlu2 %1941 }
 0xdf2   :  { %v1923_v12 = vsub.f32 1.5, %v1922_v44 }
 0xdf3   :  { %v2423_v0 = vpop.eup %2422  ;;  %v2328_v47 = vpop.permute.xlu0 %2327 }
 0xdf4   :  { %v1930_v35 = vmul.f32 %v2423_v0, %v1918_v39  ;;  %v2330_v48 = vunpack.i.h.bf16 %v2328_v47  ;;  %v2329_v43 = vunpack.i.l.bf16 %v2328_v47  ;;  %v1924_v17 = vmul.f32 %v2421_v36, %v1923_v12 }
 0xdf5   :  { %vm1936_vm3 = vweird.f32 %v2423_v0 }
 0xdf6   :  { %v1931_v29 = vmul.f32 %v2423_v0, %v1930_v35  ;;  %1991 = vmatpush.msrb.mxu3 %v2329_v43  ;;  %v1928_v51 = vsel %vm1927_vm2, %v2421_v36, %v1924_v17  ;;  %vm1937_vm10 = vmor %vm1935_vm7, %vm1936_vm3 }
 0xdf7   :  { %v1939_v25 = vmul.f32 %v1928_v51, %v1905_v24 }
 0xdf8   :  { %v1932_v45 = vmul.f32 0.5, %v1931_v29  ;;  %1992 = vmatpush.msrb.mxu3 %v2330_v48 }
 0xdf9   :  { %v1944_v7 = vmul.f32 %v1942_v41, %v1939_v25 }
 0xdfa   :  { %v1933_v40 = vsub.f32 1.5, %v1932_v45 }
 0xdfb   :  { %v1949_v55 = vadd.f32 %v1947_v54, %v1944_v7  ;;  %v1969_v46 = vpop.permute.xlu0 %1968 }
 0xdfc   :  { %v1934_v59 = vmul.f32 %v2423_v0, %v1933_v40 }
 0xdfd   :  { %2260 = vmatmul.msk.f32.vlgmr.msrb.gmra.mxu3 %vm65_vm0, %v1949_v55 }
 0xdfe   :  { %v1938_v56 = vsel %vm1937_vm10, %v2423_v0, %v1934_v59 }
 0xdff   :  { %v1940_v30 = vmul.f32 %v1938_v56, %v1906_v1  ;;  %v1102_v1 = vld [vmem:[#allocation7 + $0xd8] sm:$0xff] }
 0xe00   :  { %2109 = vmatpush.msrb.mxu1 %v1102_v1 }
 0xe01   :  { %v1945_v57 = vmul.f32 %v1942_v41, %v1940_v30 }
 0xe02   :  { %2110 = vmatpush.msrb.mxu1 %v1101_v31 }
 0xe03   :  { %v1950_v13 = vadd.f32 %v1947_v54, %v1945_v57 }
 0xe04   :  { %2111 = vmatpush.msrb.mxu1 %v1100_v19 }
 0xe05   :  { %2261 = vmatmul.msk.f32.gmra.mxu3 %vm65_vm0, %v1950_v13 }
 0xe06   :  { %2112 = vmatpush.msrb.mxu1 %v1099_v34 }
 0xe80   :  { %v1994_v61 = vpop.f32.mrf.mxu3 }
 0xe81   :  { %v3061_v62 = vadd.f32 %v1994_v61, %v1969_v46 }
 0xe83   :  { %v3064_v63 = vmul.f32 0.70710677, %v3061_v62 }
 0xe85   :  { %v2004_v50 = vmul.f32 %v3064_v63, %v3064_v63 }
 0xe87   :  { %v2005_v60 = vmin.f32 %v2004_v50, 16.0 }
 0xe88   :  { %v1997_v3 = vpop.f32.mrf.mxu3 }
 0xe89   :  { %v2006_v4 = vmul.f32 2.1237322e-06, %v2005_v60  ;;  %v2017_v5 = vmul.f32 3.8918573e-05, %v2005_v60  ;;  %v3068_v8 = vadd.f32 %v1997_v3, %v1969_v46 }
 0xe8b   :  { %v2007_v9 = vadd.f32 0.00028619796, %v2006_v4  ;;  %v2018_v10 = vadd.f32 0.001143296, %v2017_v5  ;;  %v3071_v16 = vmul.f32 0.70710677, %v3068_v8 }
 0xe8d   :  { %v2008_v20 = vmul.f32 %v2007_v9, %v2005_v60  ;;  %v2019_v14 = vmul.f32 %v2018_v10, %v2005_v60  ;;  %v2044_v23 = vmul.f32 %v3071_v16, %v3071_v16 }
 0xe8f   :  { %v2020_v24 = vadd.f32 0.014752088, %v2019_v14  ;;  %v2009_v22 = vadd.f32 0.0036580483, %v2008_v20  ;;  %v2045_v33 = vmin.f32 %v2044_v23, 16.0 }
 0xe91   :  { %v2021_v52 = vmul.f32 %v2020_v24, %v2005_v60  ;;  %v2046_v26 = vmul.f32 2.1237322e-06, %v2045_v33  ;;  %v2057_v27 = vmul.f32 3.8918573e-05, %v2045_v33  ;;  %v2010_v32 = vmul.f32 %v2009_v22, %v2005_v60 }
 0xe92   :  { %v2000_v22 = vmul.f32 0.5, %v3061_v62  ;;  %v2089_v62 = vpop.permute.xlu2 %2088 }
 0xe93   :  { %v2022_v28 = vadd.f32 0.112945676, %v2021_v52  ;;  %v2047_v2 = vadd.f32 0.00028619796, %v2046_v26  ;;  %v2058_v37 = vadd.f32 0.001143296, %v2057_v27 }
 0xe94   :  { %v2011_v53 = vadd.f32 0.05243302, %v2010_v32 }
 0xe95   :  { %v2023_v18 = vmul.f32 %v2022_v28, %v2005_v60  ;;  %v2048_v38 = vmul.f32 %v2047_v2, %v2045_v33  ;;  %v2059_v36 = vmul.f32 %v2058_v37, %v2045_v33  ;;  %v2001_v2 = vmul.f32 0.5, %v3068_v8  ;;  %v2337_v8 = vld [vmem:[#allocation7 + $0x106] ss:$0 sm:$0xff] }
 0xe96   :  { %v2012_v48 = vmul.f32 %v2011_v53, %v2005_v60 }
 0xe97   :  { %v2024_v39 = vadd.f32 0.4994258, %v2023_v18  ;;  %v2060_v44 = vadd.f32 0.014752088, %v2059_v36  ;;  %v2049_v0 = vadd.f32 0.0036580483, %v2048_v38 }
 0xe98   :  { %v2013_v51 = vadd.f32 0.18741608, %v2012_v48 }
 0xe99   :  { %v2025_v12 = vmul.f32 %v2024_v39, %v2005_v60  ;;  %v2061_v47 = vmul.f32 %v2060_v44, %v2045_v33  ;;  %v2050_v17 = vmul.f32 %v2049_v0, %v2045_v33 }
 0xe9a   :  { %v2014_v40 = vmul.f32 %v2013_v51, %v2005_v60 }
 0xe9b   :  { %v2026_v35 = vadd.f32 1.0, %v2025_v12  ;;  %v2062_v43 = vadd.f32 0.112945676, %v2061_v47  ;;  %v2051_v45 = vadd.f32 0.05243302, %v2050_v17 }
 0xe9c   :  { %v2015_v57 = vadd.f32 1.1283791, %v2014_v40 }
 0xe9d   :  { %2424 = vrcp.f32 %v2026_v35  ;;  %v2063_v29 = vmul.f32 %v2062_v43, %v2045_v33  ;;  %v2052_v55 = vmul.f32 %v2051_v45, %v2045_v33  ;;  %v2038_v30 = vand.u32 2147483648, %v2026_v35 }
 0xe9e   :  { %v2036_v46 = vand.u32 2147483647, %v2026_v35  ;;  %vm2032_vm12 = vweird.f32 %v2026_v35  ;;  %v2016_v5 = vmul.f32 %v2015_v57, %v3064_v63 }
 0xe9f   :  { %v2064_v41 = vadd.f32 0.4994258, %v2063_v29  ;;  %v2053_v61 = vadd.f32 0.18741608, %v2052_v55  ;;  %v2039_v3 = vor.u32 1.1754944e-38, %v2038_v30 }
 0xea0   :  { %vm2037_vm14 = vcmp.eq.f32.partialorder %v2036_v46, 8.507059e+37 }
 0xea1   :  { %v2065_v25 = vmul.f32 %v2064_v41, %v2045_v33  ;;  %v2054_v9 = vmul.f32 %v2053_v61, %v2045_v33 }
 0xea3   :  { %v2425_v54 = vpop.eup %2424  ;;  %v2066_v59 = vadd.f32 1.0, %v2065_v25  ;;  %v2055_v23 = vadd.f32 1.1283791, %v2054_v9 }
 0xea4   :  { %v2028_v7 = vmul.f32 %v2425_v54, %v2026_v35  ;;  %vm2033_vm11 = vweird.f32 %v2425_v54 }
 0xea5   :  { %2426 = vrcp.f32 %v2066_v59  ;;  %vm2034_vm13 = vmor %vm2032_vm12, %vm2033_vm11  ;;  %v2078_v49 = vand.u32 2147483648, %v2066_v59  ;;  %v2076_v42 = vand.u32 2147483647, %v2066_v59  ;;  %vm2072_vm4 = vweird.f32 %v2066_v59 }
 0xea6   :  { %v2029_v56 = vsub.f32 1.0, %v2028_v7  ;;  %v2056_v27 = vmul.f32 %v2055_v23, %v3071_v16 }
 0xea7   :  { %v2079_v63 = vor.u32 1.1754944e-38, %v2078_v49  ;;  %vm2077_vm5 = vcmp.eq.f32.partialorder %v2076_v42, 8.507059e+37 }
 0xea8   :  { %v2030_v13 = vmul.f32 %v2425_v54, %v2029_v56 }
 0xeaa   :  { %v2031_v50 = vadd.f32 %v2425_v54, %v2030_v13 }
 0xeab   :  { %v2427_v4 = vpop.eup %2426 }
 0xeac   :  { %v2035_v6 = vsel %vm2034_vm13, %v2425_v54, %v2031_v50  ;;  %v2068_v10 = vmul.f32 %v2427_v4, %v2066_v59  ;;  %vm2073_vm15 = vweird.f32 %v2427_v4 }
 0xead   :  { %v2040_v60 = vsel %vm2037_vm14, %v2039_v3, %v2035_v6  ;;  %vm2074_vm8 = vmor %vm2072_vm4, %vm2073_vm15 }
 0xeae   :  { %v2041_v15 = vmul.f32 %v2040_v60, %v2016_v5  ;;  %v2069_v20 = vsub.f32 1.0, %v2068_v10 }
 0xeb0   :  { %v2262_v14 = vclamps-f32 %v2041_v15, 1.0  ;;  %v2070_v24 = vmul.f32 %v2427_v4, %v2069_v20 }
 0xeb2   :  { %v2084_v52 = vadd.f32 1.0, %v2262_v14  ;;  %v2071_v1 = vadd.f32 %v2427_v4, %v2070_v24 }
 0xeb4   :  { %v2086_v26 = vmul.f32 %v2084_v52, %v2000_v22  ;;  %v2075_v33 = vsel %vm2074_vm8, %v2427_v4, %v2071_v1 }
 0xeb5   :  { %v2080_v28 = vsel %vm2077_vm5, %v2079_v63, %v2075_v33 }
 0xeb6   :  { %2264 = vmatmul.msk.f32.vlgmr.msrb.gmra.mxu1 %vm1059_vm6, %v2086_v26  ;;  %v2081_v31 = vmul.f32 %v2080_v28, %v2056_v27 }
 0xeb8   :  { %v2263_v32 = vclamps-f32 %v2081_v31, 1.0 }
 0xeba   :  { %v2085_v37 = vadd.f32 1.0, %v2263_v32 }
 0xebc   :  { %v2087_v18 = vmul.f32 %v2085_v37, %v2001_v2 }
 0xebe   :  { %2265 = vmatmul.msk.f32.gmra.mxu1 %vm1059_vm6, %v2087_v18 }
 0xf33   :  { %v2114_v19 = vpop.f32.mrf.mxu1 }
 0xf34   :  { %v2115_v38 = vadd.f32 %v2114_v19, %v2089_v62 }
 0xf36   :  { %v2120_v36 = vadd.f32 %v2115_v38, %v3034_v58 }
 0xf38   :  { %v2123_v16 = vsel %vm65_vm0, %v2120_v36, 0.0 }
 0xf39   :  { %2124 = vadd.xlane.f32.xlu1 %v2123_v16 }
 0xf3b   :  { %v2117_v39 = vpop.f32.mrf.mxu1 }
 0xf3c   :  { %v2118_v34 = vadd.f32 %v2117_v39, %v2089_v62 }
 0xf3e   :  { %v2121_v53 = vadd.f32 %v2118_v34, %v3039_v21 }
 0xf40   :  { %v2126_v44 = vsel %vm65_vm0, %v2121_v53, 0.0 }
 0xf41   :  { %2127 = vadd.xlane.f32.xlu0 %v2126_v44 }
 0xf55   :  { %2171 = vrot.lane.b32.xlu0 %v2337_v8, %s2515_s0 }
 0xfac   :  { %v2125_v12 = vpop.xlane.xlu1 %2124 }
 0xfad   :  { %v2129_v0 = vmul.f32 %v2125_v12, %v2569_v11 }
 0xfaf   :  { %v2131_v47 = vsub.f32 %v2120_v36, %v2129_v0 }
 0xfb1   :  { %v2133_v35 = vmul.f32 %v2131_v47, %v2131_v47 }
 0xfb3   :  { %v2135_v58 = vsel %vm65_vm0, %v2133_v35, 0.0 }
 0xfb4   :  { %2136 = vadd.xlane.f32.xlu2 %v2135_v58  ;;  %v2128_v48 = vpop.xlane.xlu0 %2127 }
 0xfb5   :  { %v2130_v43 = vmul.f32 %v2128_v48, %v2569_v11 }
 0xfb7   :  { %v2132_v17 = vsub.f32 %v2121_v53, %v2130_v43 }
 0xfb9   :  { %v2134_v29 = vmul.f32 %v2132_v17, %v2132_v17 }
 0xfbb   :  { %v2138_v21 = vsel %vm65_vm0, %v2134_v29, 0.0 }
 0xfbc   :  { %2139 = vadd.xlane.f32.xlu1 %v2138_v21 }
 0xfc7   :  { %v2172_v4 = vpop.permute.xlu0 %2171 }
0x1027   :  { %v2137_v51 = vpop.xlane.xlu2 %2136 }
0x1028   :  { %v2141_v41 = vmul.f32 %v2137_v51, %v2569_v11 }
0x102a   :  { %v2143_v45 = vadd.f32 1e-06, %v2141_v41 }
0x102c   :  { %2428 = vrsqrt.f32 %v2143_v45  ;;  %vm2151_vm9 = vweird.f32 %v2143_v45 }
0x102f   :  { %v2140_v25 = vpop.xlane.xlu1 %2139 }
0x1030   :  { %v2142_v54 = vmul.f32 %v2140_v25, %v2569_v11 }
0x1032   :  { %v2429_v40 = vpop.eup %2428  ;;  %v2144_v59 = vadd.f32 1e-06, %v2142_v54 }
0x1033   :  { %v2146_v7 = vmul.f32 %v2429_v40, %v2143_v45  ;;  %vm2152_vm6 = vweird.f32 %v2429_v40 }
0x1034   :  { %2430 = vrsqrt.f32 %v2144_v59  ;;  %vm2153_vm1 = vmor %vm2151_vm9, %vm2152_vm6  ;;  %vm2161_vm3 = vweird.f32 %v2144_v59 }
0x1035   :  { %v2147_v55 = vmul.f32 %v2429_v40, %v2146_v7 }
0x1037   :  { %v2148_v56 = vmul.f32 0.5, %v2147_v55 }
0x1039   :  { %v2149_v30 = vsub.f32 1.5, %v2148_v56 }
0x103a   :  { %v2431_v57 = vpop.eup %2430 }
0x103b   :  { %v2150_v13 = vmul.f32 %v2429_v40, %v2149_v30  ;;  %v2156_v46 = vmul.f32 %v2431_v57, %v2144_v59  ;;  %vm2162_vm2 = vweird.f32 %v2431_v57 }
0x103c   :  { %vm2163_vm7 = vmor %vm2161_vm3, %vm2162_vm2 }
0x103d   :  { %v2154_v61 = vsel %vm2153_vm1, %v2429_v40, %v2150_v13  ;;  %v2157_v50 = vmul.f32 %v2431_v57, %v2156_v46 }
0x103e   :  { %v2165_v3 = vmul.f32 %v2154_v61, %v2131_v47 }
0x103f   :  { %v2158_v5 = vmul.f32 0.5, %v2157_v50 }
0x1040   :  { %v2168_v6 = vmul.f32 %v2337_v8, %v2165_v3 }
0x1041   :  { %v2159_v11 = vsub.f32 1.5, %v2158_v5 }
0x1042   :  { %v2174_v60 = vadd.f32 %v2172_v4, %v2168_v6 }
0x1043   :  { %v2160_v9 = vmul.f32 %v2431_v57, %v2159_v11 }
0x1044   :  { %2176 = vst.msk [vmem:[#allocation9] sm:$0xff] %vm65_vm0, %v2174_v60 }
0x1045   :  { %v2164_v10 = vsel %vm2163_vm7, %v2431_v57, %v2160_v9 }
0x1046   :  { %v2166_v15 = vmul.f32 %v2164_v10, %v2132_v17 }
0x1048   :  { %v2169_v20 = vmul.f32 %v2337_v8, %v2166_v15 }
0x104a   :  { %v2175_v14 = vadd.f32 %v2172_v4, %v2169_v20 }
0x104c   :  { %2177 = vst.msk [vmem:[#allocation9 + $0x8] sm:$0xff] %vm65_vm0, %v2175_v14 }
0x104d   :  { %2190 = dma.vmem_to_hbm [thread:$0]  %s2183_s6, 256, %s2185_s9, [#allocation6], %s2511_s17, %s2511_s17, %s2512_s18  }
0x104e   :  { %2508 = dma.done.wait [#allocation6], 256  }
0x104f   :  { %2509 = vsyncadd [#allocation6], 4294967040 }
0x1050   :  { %2195 = vsyncpa [#allocation5], 1 }
0x1051   :  { %2196 = vsyncpa [#allocation8], 1 }
0x1052   :  { %2197 = vsyncpa [#allocation6], 1 }

</bundles_post_ra>
